<compile_context>
chip_gen: v7x
topology: tpu7x:2x2x1
jax: 0.10.0
libtpu: 0.0.40
codegen_flags: <defaults>
</compile_context>

<pallas_src>
import math

import jax
import jax.numpy as jnp
from jax.experimental import pallas as pl
from jax.experimental.pallas import tpu as pltpu

MLPMAT_INNER_SIZE = 64
MATRIX_NUM_PARAMS = MLPMAT_INNER_SIZE * MLPMAT_INNER_SIZE   # 4096
MLP_SCALE = 4


def _gelu_tanh(x):
    c = math.sqrt(2.0 / math.pi)
    return 0.5 * x * (1.0 + jnp.tanh(c * (x + 0.044715 * x * x * x)))


def fat_mlp_kernel(x_ref, wfc_ref, bfc_ref, wpb_ref, bpb_ref, wpm_ref, bpm_ref,
                   m_ref, b_ref, h_ref):
    """Grid = (row_tiles, m_col_tiles).  Hidden h cached in VMEM scratch."""
    j = pl.program_id(1)

    # First m-column step for this row tile: compute the hidden activation
    # once, stash it (bf16) in VMEM scratch; reused for every m column tile.
    @pl.when(j == 0)
    def _():
        x = x_ref[...].astype(jnp.bfloat16)
        h = jnp.dot(x, wfc_ref[...], preferred_element_type=jnp.float32)
        h = _gelu_tanh(h + bfc_ref[...])                       # f32 GELU
        h_ref[...] = h.astype(jnp.bfloat16)

    # Lane-dense m tile: (tm, tn) with tn a multiple of 128 -> unmasked vst.
    m_ref[...] = (jnp.dot(h_ref[...], wpm_ref[...],
                          preferred_element_type=jnp.float32)
                  + bpm_ref[...]).astype(m_ref.dtype)

    # Small `b` output on the LAST column step so the j==0 step (fc + GELU +
    # first m tile) doesn't also carry the b matmul.
    @pl.when(j == pl.num_programs(1) - 1)
    def _():
        b_ref[...] = (jnp.dot(h_ref[...], wpb_ref[...],
                              preferred_element_type=jnp.float32)
                      + bpb_ref[...]).astype(b_ref.dtype)


def _round_up(a, b):
    return (a + b - 1) // b * b


def _vmem_capacity_bytes():
    try:
        cap = getattr(pltpu.get_tpu_info(), "vmem_capacity_bytes", None)
        if cap:
            return int(cap)
    except Exception:
        pass
    return 64 * 1024 * 1024           # conservative (v7x per-TensorCore)


def fat_mlp_forward(x, params):
    """Returns (m, b) exactly like FatMLP.forward.

    params (pre-transposed, i.e. (in_features, out_features)):
      w_fc   : (C, 4C)         b_fc   : (4C,)
      w_proj : (4C, C + 4096)  b_proj : (C + 4096,)
    """
    C = x.shape[-1]
    H = MLP_SCALE * C
    Nm = MATRIX_NUM_PARAMS

    # ---- flatten leading dims into one row axis ----------------------------
    lead = x.shape[:-1]
    M = 1
    for d in lead:
        M *= d
    x2 = x.reshape(M, C)
    M8 = _round_up(M, 8)

    # ---- VMEM budget -> plan selection (resident wpm vs. streamed) ---------
    cap = _vmem_capacity_bytes()
    vmem_limit = int(min(100 * 2**20, max(32 * 2**20, cap - 20 * 2**20)))
    budget = vmem_limit - 8 * 2**20

    def max_tm_for(tn):
        # Conservative: assume every pipelined operand is double-buffered.
        fixed = (2 * C * H * 2            # w_fc (bf16)
                 + 2 * H * C * 2          # w_proj[:, :C] (bf16)
                 + 2 * H * tn * 2         # w_proj[:, C:] column tile (bf16)
                 + 2 * (H + C + tn) * 4)  # biases (f32)
        per_tm = (2 * C * 4               # x tile (f32 in)
                  + 2 * tn * 4            # m out tile (f32)
                  + 2 * C * 4             # b out tile (f32)
                  + H * 2)                # h scratch (bf16)
        avail = budget - fixed
        if avail <= 0:
            return 0
        return min(1024, avail // per_tm) // 8 * 8

    tm_resident = max_tm_for(Nm)
    if tm_resident >= min(256, M8):
        tn = Nm                            # wpm fully resident (128 MiB parts)
        tm_cap = tm_resident
    else:
        tn = min(512, Nm)                  # streamed column tiles (64 MiB parts)
        tm_cap = max(8, max_tm_for(tn))
    assert Nm % tn == 0, "m-column tile must divide 4096"

    # ---- row tile: prefer a divisor of M8 so no wrapper pad/slice is needed -
    tm = max(8, min(tm_cap, M8))
    tm = tm // 8 * 8
    for cand in range(tm, max(8, tm // 2) - 1, -8):
        if M8 % cand == 0:
            tm = cand
            break
    M_pad = _round_up(M8, tm)

    # Keep >=2 row tiles when possible so the "parallel" row axis can shard
    # across v7x's two TensorCores.
    if M_pad // tm == 1 and M_pad >= 16 and M_pad % 16 == 0:
        tm = M_pad // 2

    if M_pad != M:
        x2 = jnp.pad(x2, ((0, M_pad - M), (0, 0)))

    # ---- split c_proj into the `b` and `m` halves; bf16 weights ------------
    wfc = params["w_fc"].astype(jnp.bfloat16)                # (C, H)
    wpb = params["w_proj"][:, :C].astype(jnp.bfloat16)       # (H, C)
    wpm = params["w_proj"][:, C:].astype(jnp.bfloat16)       # (H, Nm)
    bfc = params["b_fc"].reshape(1, H).astype(jnp.float32)
    bpb = params["b_proj"][:C].reshape(1, C).astype(jnp.float32)
    bpm = params["b_proj"][C:].reshape(1, Nm).astype(jnp.float32)

    grid = (M_pad // tm, Nm // tn)

    m2, b2 = pl.pallas_call(
        fat_mlp_kernel,
        out_shape=(jax.ShapeDtypeStruct((M_pad, Nm), jnp.float32),
                   jax.ShapeDtypeStruct((M_pad, C), jnp.float32)),
        grid_spec=pltpu.PrefetchScalarGridSpec(
            num_scalar_prefetch=0,
            grid=grid,
            in_specs=[
                pl.BlockSpec((tm, C), lambda i, j: (i, 0)),    # x rows
                pl.BlockSpec((C, H), lambda i, j: (0, 0)),     # w_fc
                pl.BlockSpec((1, H), lambda i, j: (0, 0)),     # b_fc
                pl.BlockSpec((H, C), lambda i, j: (0, 0)),     # w_proj[:, :C]
                pl.BlockSpec((1, C), lambda i, j: (0, 0)),     # b_proj[:C]
                pl.BlockSpec((H, tn), lambda i, j: (0, j)),    # w_proj[:, C:]
                pl.BlockSpec((1, tn), lambda i, j: (0, j)),    # b_proj[C:]
            ],
            out_specs=(
                pl.BlockSpec((tm, tn), lambda i, j: (i, j)),   # m (lane-dense)
                pl.BlockSpec((tm, C), lambda i, j: (i, 0)),    # b (resident over j)
            ),
            scratch_shapes=[pltpu.VMEM((tm, H), jnp.bfloat16)],  # cached hidden
        ),
        compiler_params=pltpu.CompilerParams(
            dimension_semantics=("parallel", "arbitrary"),
            vmem_limit_bytes=vmem_limit,
        ),
    )(x2, wfc, bfc, wpb, bpb, wpm, bpm)

    if M_pad != M:
        m2 = m2[:M]
        b2 = b2[:M]
    m = m2.reshape(*lead, Nm)
    b = b2.reshape(*lead, C)
    return m, b


# ----------------------------- pure-JAX reference ----------------------------
def fat_mlp_reference(x, params):
    C = params["w_fc"].shape[0]
    h = _gelu_tanh(x @ params["w_fc"] + params["b_fc"])
    out = h @ params["w_proj"] + params["b_proj"]
    b = out[..., :C]
    m = out[..., C:]
    return m, b


# --------------------------------- main ---------------------------------------
if __name__ == "__main__":
    B, T, C = 2, 8, 32            # n_embd = 32
    H = MLP_SCALE * C             # 128
    Nout = C + MATRIX_NUM_PARAMS  # 32 + 4096

    key = jax.random.PRNGKey(0)
    k = jax.random.split(key, 5)
    params = {
        # Linear weights stored pre-transposed: (in_features, out_features)
        "w_fc": 0.02 * jax.random.normal(k[0], (C, H), jnp.float32),
        "b_fc": 0.01 * jax.random.normal(k[1], (H,), jnp.float32),
        "w_proj": 0.02 * jax.random.normal(k[2], (H, Nout), jnp.float32),
        "b_proj": 0.01 * jax.random.normal(k[3], (Nout,), jnp.float32),
    }
    x = jax.random.normal(k[4], (B, T, C), jnp.float32)

    m, b = fat_mlp_forward(x, params)
    jax.block_until_ready(m)
    jax.block_until_ready(b)

    m_expect, b_expect = fat_mlp_reference(x, params)
    assert m.shape == (B, T, MATRIX_NUM_PARAMS), m.shape
    assert b.shape == (B, T, C), b.shape
    # bf16 MXU operands (f32 accumulation) -> slightly looser tolerance than f32.
    assert jnp.allclose(m, m_expect, atol=5e-3, rtol=5e-2), "m mismatch vs reference"
    assert jnp.allclose(b, b_expect, atol=5e-3, rtol=5e-2), "b mismatch vs reference"
    assert bool(jnp.all(jnp.isfinite(m))) and bool(jnp.all(jnp.isfinite(b)))

    print("KERNEL_OK")
</pallas_src>

<mosaic_0001>
module attributes {stable_mosaic.version = 11 : i64} {
  func.func @fat_mlp_kernel(%arg0: i32, %arg1: i32, %arg2: memref<8x32xf32, #tpu.memory_space<vmem>>, %arg3: memref<32x128xbf16, #tpu.memory_space<vmem>>, %arg4: memref<1x128xf32, #tpu.memory_space<vmem>>, %arg5: memref<128x32xbf16, #tpu.memory_space<vmem>>, %arg6: memref<1x32xf32, #tpu.memory_space<vmem>>, %arg7: memref<128x4096xbf16, #tpu.memory_space<vmem>>, %arg8: memref<1x4096xf32, #tpu.memory_space<vmem>>, %arg9: memref<8x4096xf32, #tpu.memory_space<vmem>>, %arg10: memref<8x32xf32, #tpu.memory_space<vmem>>, %arg11: memref<8x128xbf16, #tpu.memory_space<vmem>>) attributes {dimension_semantics = [#tpu.dimension_semantics<parallel>, #tpu.dimension_semantics<arbitrary>], iteration_bounds = array<i64: 2, 1>, scalar_prefetch = 0 : i64, scratch_operands = 1 : i64, tpu.core_type = #tpu.core_type<tc>, window_params = [{transform_indices = @transform_0, window_bounds = array<i64: 8, 32>}, {pipeline_mode = #tpu.pipeline_mode<synchronous>, transform_indices = @transform_1, window_bounds = array<i64: 32, 128>}, {pipeline_mode = #tpu.pipeline_mode<synchronous>, transform_indices = @transform_2, window_bounds = array<i64: 1, 128>}, {pipeline_mode = #tpu.pipeline_mode<synchronous>, transform_indices = @transform_3, window_bounds = array<i64: 128, 32>}, {pipeline_mode = #tpu.pipeline_mode<synchronous>, transform_indices = @transform_4, window_bounds = array<i64: 1, 32>}, {transform_indices = @transform_5, window_bounds = array<i64: 128, 4096>}, {transform_indices = @transform_6, window_bounds = array<i64: 1, 4096>}, {transform_indices = @transform_7, window_bounds = array<i64: 8, 4096>}, {transform_indices = @transform_8, window_bounds = array<i64: 8, 32>}]} {
    %c0_i32 = arith.constant 0 : i32
    %0 = arith.cmpi eq, %arg1, %c0_i32 : i32
    %1 = arith.extui %0 : i1 to i32
    %c0_i32_0 = arith.constant 0 : i32
    %2 = arith.cmpi ne, %1, %c0_i32_0 : i32
    scf.if %2 {
      %c0_10 = arith.constant 0 : index
      %c0_11 = arith.constant 0 : index
      %13 = vector.load %arg2[%c0_10, %c0_11] : memref<8x32xf32, #tpu.memory_space<vmem>>, vector<8x32xf32>
      %14 = arith.truncf %13 : vector<8x32xf32> to vector<8x32xbf16>
      %c0_12 = arith.constant 0 : index
      %c0_13 = arith.constant 0 : index
      %15 = vector.load %arg3[%c0_12, %c0_13] : memref<32x128xbf16, #tpu.memory_space<vmem>>, vector<32x128xbf16>
      %cst_14 = arith.constant dense<0.000000e+00> : vector<8x128xf32>
      %16 = tpu.matmul %14, %15, %cst_14 {dimension_numbers = #tpu.dot_dimension_numbers<[1], [0], [0], [1], [0, 0, 1, 1], [], []>} : vector<8x32xbf16>, vector<32x128xbf16>, vector<8x128xf32> -> vector<8x128xf32>
      %c0_15 = arith.constant 0 : index
      %c0_16 = arith.constant 0 : index
      %17 = vector.load %arg4[%c0_15, %c0_16] : memref<1x128xf32, #tpu.memory_space<vmem>>, vector<1x128xf32>
      %18 = vector.broadcast %17 : vector<1x128xf32> to vector<8x128xf32>
      %19 = arith.addf %16, %18 : vector<8x128xf32>
      %cst_17 = arith.constant 5.000000e-01 : f32
      %20 = vector.broadcast %cst_17 : f32 to vector<8x128xf32>
      %21 = arith.mulf %20, %19 : vector<8x128xf32>
      %cst_18 = arith.constant 4.471500e-02 : f32
      %22 = vector.broadcast %cst_18 : f32 to vector<8x128xf32>
      %23 = arith.mulf %22, %19 : vector<8x128xf32>
      %24 = arith.mulf %23, %19 : vector<8x128xf32>
      %25 = arith.mulf %24, %19 : vector<8x128xf32>
      %26 = arith.addf %19, %25 : vector<8x128xf32>
      %cst_19 = arith.constant 0.797884583 : f32
      %27 = vector.broadcast %cst_19 : f32 to vector<8x128xf32>
      %28 = arith.mulf %27, %26 : vector<8x128xf32>
      %29 = math.tanh %28 : vector<8x128xf32>
      %cst_20 = arith.constant 1.000000e+00 : f32
      %30 = vector.broadcast %cst_20 : f32 to vector<8x128xf32>
      %31 = arith.addf %30, %29 : vector<8x128xf32>
      %32 = arith.mulf %21, %31 : vector<8x128xf32>
      %33 = arith.truncf %32 : vector<8x128xf32> to vector<8x128xbf16>
      %c0_21 = arith.constant 0 : index
      %c0_22 = arith.constant 0 : index
      %34 = vector.load %arg11[%c0_21, %c0_22] : memref<8x128xbf16, #tpu.memory_space<vmem>>, vector<8x128xbf16>
      tpu.vector_store %arg11[%c0_21, %c0_22], %33 {strides = array<i32>} : memref<8x128xbf16, #tpu.memory_space<vmem>>, vector<8x128xbf16>,
    } else {
    }
    %c0 = arith.constant 0 : index
    %c0_1 = arith.constant 0 : index
    %3 = vector.load %arg11[%c0, %c0_1] : memref<8x128xbf16, #tpu.memory_space<vmem>>, vector<8x128xbf16>
    %c0_2 = arith.constant 0 : index
    %c0_3 = arith.constant 0 : index
    %4 = vector.load %arg7[%c0_2, %c0_3] : memref<128x4096xbf16, #tpu.memory_space<vmem>>, vector<128x4096xbf16>
    %cst = arith.constant dense<0.000000e+00> : vector<8x4096xf32>
    %5 = tpu.matmul %3, %4, %cst {dimension_numbers = #tpu.dot_dimension_numbers<[1], [0], [0], [1], [0, 0, 1, 1], [], []>} : vector<8x128xbf16>, vector<128x4096xbf16>, vector<8x4096xf32> -> vector<8x4096xf32>
    %c0_4 = arith.constant 0 : index
    %c0_5 = arith.constant 0 : index
    %6 = vector.load %arg8[%c0_4, %c0_5] : memref<1x4096xf32, #tpu.memory_space<vmem>>, vector<1x4096xf32>
    %7 = vector.broadcast %6 : vector<1x4096xf32> to vector<8x4096xf32>
    %8 = arith.addf %5, %7 : vector<8x4096xf32>
    %c0_6 = arith.constant 0 : index
    %c0_7 = arith.constant 0 : index
    %9 = vector.load %arg9[%c0_6, %c0_7] : memref<8x4096xf32, #tpu.memory_space<vmem>>, vector<8x4096xf32>
    tpu.vector_store %arg9[%c0_6, %c0_7], %8 {strides = array<i32>} : memref<8x4096xf32, #tpu.memory_space<vmem>>, vector<8x4096xf32>,
    %c0_i32_8 = arith.constant 0 : i32
    %10 = arith.cmpi eq, %arg1, %c0_i32_8 : i32
    %11 = arith.extui %10 : i1 to i32
    %c0_i32_9 = arith.constant 0 : i32
    %12 = arith.cmpi ne, %11, %c0_i32_9 : i32
    scf.if %12 {
      %c0_10 = arith.constant 0 : index
      %c0_11 = arith.constant 0 : index
      %13 = vector.load %arg11[%c0_10, %c0_11] : memref<8x128xbf16, #tpu.memory_space<vmem>>, vector<8x128xbf16>
      %c0_12 = arith.constant 0 : index
      %c0_13 = arith.constant 0 : index
      %14 = vector.load %arg5[%c0_12, %c0_13] : memref<128x32xbf16, #tpu.memory_space<vmem>>, vector<128x32xbf16>
      %cst_14 = arith.constant dense<0.000000e+00> : vector<8x32xf32>
      %15 = tpu.matmul %13, %14, %cst_14 {dimension_numbers = #tpu.dot_dimension_numbers<[1], [0], [0], [1], [0, 0, 1, 1], [], []>} : vector<8x128xbf16>, vector<128x32xbf16>, vector<8x32xf32> -> vector<8x32xf32>
      %c0_15 = arith.constant 0 : index
      %c0_16 = arith.constant 0 : index
      %16 = vector.load %arg6[%c0_15, %c0_16] : memref<1x32xf32, #tpu.memory_space<vmem>>, vector<1x32xf32>
      %17 = vector.broadcast %16 : vector<1x32xf32> to vector<8x32xf32>
      %18 = arith.addf %15, %17 : vector<8x32xf32>
      %c0_17 = arith.constant 0 : index
      %c0_18 = arith.constant 0 : index
      %19 = vector.load %arg10[%c0_17, %c0_18] : memref<8x32xf32, #tpu.memory_space<vmem>>, vector<8x32xf32>
      tpu.vector_store %arg10[%c0_17, %c0_18], %18 {strides = array<i32>} : memref<8x32xf32, #tpu.memory_space<vmem>>, vector<8x32xf32>,
    } else {
    }
    return
  }
  func.func @transform_0(%arg0: i32, %arg1: i32) -> (i32, i32) {
    %c0_i32 = arith.constant 0 : i32
    %c0_i32_0 = arith.constant 0 : i32
    return %arg0, %c0_i32 : i32, i32
  }
  func.func @transform_1(%arg0: i32, %arg1: i32) -> (i32, i32) {
    %c0_i32 = arith.constant 0 : i32
    %c0_i32_0 = arith.constant 0 : i32
    %c0_i32_1 = arith.constant 0 : i32
    return %c0_i32, %c0_i32_0 : i32, i32
  }
  func.func @transform_2(%arg0: i32, %arg1: i32) -> (i32, i32) {
    %c0_i32 = arith.constant 0 : i32
    %c0_i32_0 = arith.constant 0 : i32
    %c0_i32_1 = arith.constant 0 : i32
    return %c0_i32, %c0_i32_0 : i32, i32
  }
  func.func @transform_3(%arg0: i32, %arg1: i32) -> (i32, i32) {
    %c0_i32 = arith.constant 0 : i32
    %c0_i32_0 = arith.constant 0 : i32
    %c0_i32_1 = arith.constant 0 : i32
    return %c0_i32, %c0_i32_0 : i32, i32
  }
  func.func @transform_4(%arg0: i32, %arg1: i32) -> (i32, i32) {
    %c0_i32 = arith.constant 0 : i32
    %c0_i32_0 = arith.constant 0 : i32
    %c0_i32_1 = arith.constant 0 : i32
    return %c0_i32, %c0_i32_0 : i32, i32
  }
  func.func @transform_5(%arg0: i32, %arg1: i32) -> (i32, i32) {
    %c0_i32 = arith.constant 0 : i32
    %c0_i32_0 = arith.constant 0 : i32
    return %c0_i32, %arg1 : i32, i32
  }
  func.func @transform_6(%arg0: i32, %arg1: i32) -> (i32, i32) {
    %c0_i32 = arith.constant 0 : i32
    %c0_i32_0 = arith.constant 0 : i32
    return %c0_i32, %arg1 : i32, i32
  }
  func.func @transform_7(%arg0: i32, %arg1: i32) -> (i32, i32) {
    %c0_i32 = arith.constant 0 : i32
    return %arg0, %arg1 : i32, i32
  }
  func.func @transform_8(%arg0: i32, %arg1: i32) -> (i32, i32) {
    %c0_i32 = arith.constant 0 : i32
    %c0_i32_0 = arith.constant 0 : i32
    return %arg0, %c0_i32 : i32, i32
  }
}

</mosaic_0001>

<bundles_post_ra>
// kernel: tpu_custom_call.1
= control target key start
LH: loop header
LB: loop body
LE: loop exit
PB: predicated region body
PF: predicated region fallthrough
CT: control target
= control target key end

     0   :  { %s4132_s0 = inlined_call_operand.vmem [shape: f32[16,32], index: 0, kind: input, shape index: {}]   ;;  %s4133_s1 = inlined_call_operand.vmem [shape: bf16[32,128], index: 1, kind: input, shape index: {}]   ;;  %s4134_s2 = inlined_call_operand.vmem [shape: f32[1,128], index: 2, kind: input, shape index: {}]   ;;  %s4135_s3 = inlined_call_operand.vmem [shape: bf16[128,32], index: 3, kind: input, shape index: {}]   ;;  %s4136_s4 = inlined_call_operand.vmem [shape: f32[1,32], index: 4, kind: input, shape index: {}]   ;;  %s4137_s5 = inlined_call_operand.hbm [shape: bf16[128,4096], index: 5, kind: input, shape index: {}]   ;;  %s4138_s6 = inlined_call_operand.vmem [shape: f32[1,4096], index: 6, kind: input, shape index: {}]   ;;  %s4139_s7 = inlined_call_operand.hbm [shape: f32[16,4096], index: 7, kind: output, shape index: {0}]   ;;  %s4140_s8 = inlined_call_operand.hbm [shape: f32[16,32], index: 8, kind: output, shape index: {1}]  }
   0x1   :  { %4145 = sst [smem:[#allocation12_spill]] %s4132_s0 }
   0x2   :  { %14 = vsyncpa [#allocation4], 0 }
   0x3   :  { %15 = vsyncpa [#allocation5], 0 }
   0x4   :  { %17 = vsyncpa [#allocation5 + $0x1], 0 }
   0x5   :  { %18 = vsyncpa [#allocation8], 0 }
   0x6   :  { %20 = vsyncpa [#allocation8 + $0x1], 0  ;;  %s3742_s27 = smov 0   ;;  %s3744_s28 = smov 0  }
   0x7   :  { %s3746_s29 = smov 0   ;;  %s3748_s30 = smov 0  }
   0x8   :  { %s3750_s9 = smov 0   ;;  %s3752_s10 = smov 0  }
   0x9 LB: > { %s3128_s11 = sadd.s32 4294967295, %s3687_s10   ;;  %s3129_s12 = sadd.s32 4294967294, %s3687_s10   ;;  %s3687_s10 = sphi %s3752_s10, %s26_s10   ;;  %s3683_s9 = sphi %s3750_s9, %s4160_s9   ;;  %s3679_s30 = sphi %s3748_s30, %s4159_s30   ;;  %s3675_s29 = sphi %s3746_s29, %s4158_s29   ;;  %s3671_s28 = sphi %s3744_s28, %s4157_s28   ;;  %s3667_s27 = sphi %s3742_s27, %s4156_s27  }
   0xa   : > { %s38_s13 = sadd.s32 1, %s3683_s9  ;;  %s209_s14 = sadd.s32 1, %s3675_s29 }
   0xb   : > { %p40_p0 = scmp.ge.s32.totalorder %s38_s13, 2  ;;  %p219_p1 = scmp.ne.s32.totalorder %s3675_s29, %s3671_s28 }
   0xc   : > { %p220_p2 = scmp.eq.s32.totalorder %s3128_s11, 1  ;;  %p225_p3 = scmp.ne.s32.totalorder %s3671_s28, %s3667_s27 }
   0xd   : > { %s4162_s13 = smov (%p40_p0, %s38_s13), 0  ;;  %p226_p5 = scmp.eq.s32.totalorder %s3129_s12, 1 }
   0xe   : > { %p3782_p4 = por %p220_p2, %p219_p1  ;;  %s204_s16 = ssub.s32 %s3683_s9, %s4162_s13 }
   0xf   : > { %p3130_p6 = scmp.ge.s32.totalorder %s3687_s10, 1  ;;  %p207_p7 = scmp.eq.s32.totalorder %s204_s16, 0 }
  0x10   : > { %s4146_s15 = scalar_select %p3782_p4, 1, 0 }
  0x11   : > { %p3789_p8 = por %p226_p5, %p225_p3  ;;  %p259_p9 = scmp.lt.s32.totalorder %s3687_s10, 3 }
  0x12   : > { %s3795_s18 = scalar_select %p207_p7, %s3675_s29, %s209_s14  }
  0x13   : > { %s4147_s17 = scalar_select %p3789_p8, 1, 0 }
  0x14   : > { %p3797_p10 = pnand %p3130_p6, %p259_p9  ;;  %p3801_p11 = scmp.eq.s32.totalorder %s3128_s11, 0 }
  0x15   : > { %s3689_s21 = smov [#allocation3]   ;;  %s3545_s26 = scalar_lea.hbm %s4137_s5, 32768 }
  0x16   : > { %s4148_s19 = scalar_select %p3797_p10, 1, 0 }
  0x17   : > { %s4149_s20 = scalar_select %p3801_p11, 1, 0 }
  0x18   : > { %p3464_p12 = pneg %p3797_p10  ;;  %s286_s22 = sshll.u32 %s3689_s21, 4  ;;  %s287_s22 = int_to_ptr.vmem [resolvable:$true] %s286_s22 }
  0x19   : > { %p3546_p0 = scmp.ne.s32.totalorder %s4137_s5, %s3545_s26  ;;  %p3552_p5 = scmp.lt.u32.totalorder %s3545_s26, %s4137_s5 }
  0x1a   : > { %p3809_p13 = pnand %p3801_p11, %p3464_p12 }
  0x1c   : > { %p3547_p1 = pneg %p3809_p13 }
  0x1e   : > { %p3548_p2 = pnand %p3547_p1, %p3546_p0 }
  0x20   : > { %p3549_p3 = pneg %p3548_p2 }
  0x22   : > { %p3554_p6 = pnand %p3552_p5, %p3549_p3 }
  0x24   : > { %3557 = shalt.err (!%p3554_p6)
}
  0x25   : > { %s3558_s21 = scalar_lea.vmem %s287_s22, 32768  ;;  %p3566_p8 = scmp.lt.s32.totalorder %s287_s22, %s287_s22 }
  0x26   : > { %p3559_p7 = scmp.ne.s32.totalorder %s287_s22, %s3558_s21  ;;  %p3567_p4 = scmp.lt.s32.totalorder %s3558_s21, %s3558_s21 }
  0x28   : > { %p3561_p9 = pnand %p3559_p7, %p3547_p1  ;;  %p3568_p11 = por %p3567_p4, %p3566_p8 }
  0x2a   : > { %p3562_p12 = pneg %p3561_p9 }
  0x2c   : > { %p3569_p10 = pnand %p3568_p11, %p3562_p12 }
  0x2e   : > { %3572 = shalt.err (!%p3569_p10)
}
  0x2f   : > { %s3690_s24 = smov 2048   ;;  %s3691_s25 = smov 128  }
  0x30   : > { %3467 = dma.hbm_to_vmem [thread:$0]  (!%p3809_p13), %s4137_s5, 32768, %s287_s22, [#allocation4], %s3690_s24, %s3690_s24, %s3691_s25  }
  0x31   : > { %p4151_p0 = scmp.ne.s32.totalorder %s4148_s19, 0 }
  0x32   : > { %p4152_p2 = scmp.ne.s32.totalorder (!%p4151_p0), %s4149_s20, 0 }
  0x33   : > { %317 = sbr.rel (%p4151_p0) target bundleno = 802 (0x322), region = 48 }
  0x3a   : > { %3654 = dma.done.wait (%p4152_p2), [#allocation4], 32768  }
  0x3b   : > { %3656 = vsyncadd (%p4152_p2), [#allocation4], 4294934528  ;;  %p359_p4 = scmp.lt.s32.totalorder %s3679_s30, 1  ;;  %v3692_v0 = vmov 0.0   ;;  %vm3693_vm0 = vmmov 0   ;;  %s4153_s0 = sld [smem:[#allocation12_spill]] }
  0x3c   : > { %3428 = vmatprep.subr.bf16.mxu0 %v3692_v0  ;;  %3432 = vmatprep.mubr.msk.bf16.mxu0 %vm3693_vm0, %v3692_v0  ;;  %v3532_v1 = vld [vmem:[%s4133_s1] sm:$0xff]   ;;  %v3533_v2 = vld [vmem:[%s4133_s1 + $0x8] sm:$0xff]   ;;  %vm400_vm1 = vcmask 261120   ;;  %s3897_s12 = sand.u32 1, %s3671_s28   ;;  %s3415_s21 = sshll.u32 %s3679_s30, 12 }
  0x3d   : > { %s360_s22 = scalar_select %p359_p4, %s3679_s30, 1  ;;  %3429 = vmatpush3.bf16.msra.mxu0 %v3532_v1  ;;  %v456_v5 = vld [vmem:[#allocation3] sm:$0xff]  ;;  %v457_v7 = vld [vmem:[#allocation3 + $0x8] sm:$0xff] }
  0x3e   : > { %3430 = vmatprep.subr.bf16.mxu0 %v3692_v0  ;;  %v472_v6 = vld [vmem:[#allocation3 + $0x80] sm:$0xff]  ;;  %v473_v9 = vld [vmem:[#allocation3 + $0x88] sm:$0xff]  ;;  %s3136_s19 = sshll.u32 %s3897_s12, 8  ;;  %s4045_s11 = scalar_lea.hbm %s4139_s7, %s3415_s21 }
  0x3f   : > { %s3138_s23 = sshll.u32 %s360_s22, 3  ;;  %v3144_v8 = vcombine.high %v456_v5, %v472_v6  ;;  %v3145_v10 = vcombine.low %v457_v7, %v473_v9  ;;  %v3146_v11 = vcombine.high %v457_v7, %v473_v9  ;;  %v3143_v12 = vcombine.low %v456_v5, %v472_v6  ;;  %v488_v13 = vld [vmem:[#allocation3 + $0x100] sm:$0xff]  ;;  %v489_v15 = vld [vmem:[#allocation3 + $0x108] sm:$0xff]  ;;  %v458_v6 = vld [vmem:[#allocation3 + $0x10] sm:$0xff]  ;;  %s3921_s26 = scalar_lea.vmem [#allocation6], %s3136_s19 }
  0x40   : > { %v504_v14 = vld [vmem:[#allocation3 + $0x180] sm:$0xff]  ;;  %v505_v17 = vld [vmem:[#allocation3 + $0x188] sm:$0xff]  ;;  %v474_v7 = vld [vmem:[#allocation3 + $0x90] sm:$0xff]  ;;  %s2987_s20 = sshll.u32 %s3921_s26, 4  ;;  %s2966_s22 = scalar_lea.sflag [#allocation5], %s3897_s12  ;;  %s4047_s20 = int_to_ptr.vmem [resolvable:$true] %s2987_s20 }
  0x41   : > { %s362_s14 = scalar_lea.vmem %s4153_s0, %s3138_s23  ;;  %3431 = vmatpush3.bf16.msra.mxu0 %v3533_v2  ;;  %2160 = vmatprep.subr.bf16.mxu1 %v3144_v8  ;;  %v3176_v16 = vcombine.high %v488_v13, %v504_v14  ;;  %v3177_v18 = vcombine.low %v489_v15, %v505_v17  ;;  %v3178_v19 = vcombine.high %v489_v15, %v505_v17  ;;  %v520_v21 = vld [vmem:[#allocation3 + $0x200] sm:$0xff]  ;;  %v521_v23 = vld [vmem:[#allocation3 + $0x208] sm:$0xff]  ;;  %v459_v8 = vld [vmem:[#allocation3 + $0x18] sm:$0xff]  ;;  %s3573_s23 = scalar_lea.vmem %s4047_s20, 4096 }
  0x42   : > { %v375_v3 = vld [vmem:[%s362_s14] sm:$0xff]  ;;  %2201 = vmatprep.subr.bf16.mxu0 %v3146_v11  ;;  %2161 = vmatpush1.bf16.msra.mxu1 %v3143_v12  ;;  %v3175_v20 = vcombine.low %v488_v13, %v504_v14  ;;  %v537_v25 = vld [vmem:[#allocation3 + $0x288] sm:$0xff]  ;;  %v3148_v9 = vcombine.high %v458_v6, %v474_v7  ;;  %v3147_v11 = vcombine.low %v458_v6, %v474_v7  ;;  %v3694_v14 = vmov 0   ;;  %v650_v7 = vld [vmem:[#allocation3 + $0x610] sm:$0xff]  ;;  %p3574_p8 = scmp.ne.s32.totalorder %s4047_s20, %s3573_s23  ;;  %p4154_p10 = scmp.ne.s32.totalorder %s4146_s15, 0 }
  0x43   : > { %v376_v4 = vpack.c.bf16 %v375_v3, %v375_v3  ;;  %2162 = vmatprep.subr.bf16.mxu1 %v3176_v16  ;;  %v536_v22 = vld [vmem:[#allocation3 + $0x280] sm:$0xff]  ;;  %v3209_v26 = vcombine.low %v521_v23, %v537_v25  ;;  %v3210_v27 = vcombine.high %v521_v23, %v537_v25  ;;  %v553_v31 = vld [vmem:[#allocation3 + $0x308] sm:$0xff]  ;;  %2192 = vmatprep.mubr.bf16.mxu1 %v3694_v14  ;;  %v3139_v15 = vld [vmem:[%s4134_s2] ss:$0 sm:$0xff]  ;;  %s3695_s19 = smov [#allocation6]  }
  0x44   : > { %v3208_v24 = vcombine.high %v520_v21, %v536_v22  ;;  %v3207_v28 = vcombine.low %v520_v21, %v536_v22  ;;  %v552_v29 = vld [vmem:[#allocation3 + $0x300] sm:$0xff]  ;;  %v569_v33 = vld [vmem:[#allocation3 + $0x388] sm:$0xff]  ;;  %p3575_p11 = pnand %p3574_p8, %p4154_p10  ;;  %s3577_s14 = sshll.u32 %s3695_s19, 4  ;;  %s3578_s14 = int_to_ptr.vmem [resolvable:$false] %s3577_s14 }
  0x45   : > { %3433 = vmatmul.mubr.msk.bf16.vlgmr.msra.gmra.mrb[0].mxu0 %vm400_vm1, %v376_v4  ;;  %v568_v30 = vld [vmem:[#allocation3 + $0x380] sm:$0xff]  ;;  %v3241_v34 = vcombine.low %v553_v31, %v569_v33  ;;  %v3242_v35 = vcombine.high %v553_v31, %v569_v33  ;;  %v585_v39 = vld [vmem:[#allocation3 + $0x408] sm:$0xff]  ;;  %v490_v31 = vld [vmem:[#allocation3 + $0x110] sm:$0xff]  ;;  %s3579_s16 = scalar_lea.vmem %s3578_s14, 8192  ;;  %p3580_p1 = scmp.lt.s32.totalorder %s4047_s20, %s3578_s14 }
  0x46   : > { %2202 = vmatpush1.bf16.msra.mxu0 %v3145_v10  ;;  %2163 = vmatpush1.bf16.msra.mxu1 %v3175_v20  ;;  %v3240_v32 = vcombine.high %v552_v29, %v568_v30  ;;  %v3239_v36 = vcombine.low %v552_v29, %v568_v30  ;;  %v584_v37 = vld [vmem:[#allocation3 + $0x400] sm:$0xff]  ;;  %v601_v41 = vld [vmem:[#allocation3 + $0x488] sm:$0xff]  ;;  %v475_v10 = vld [vmem:[#allocation3 + $0x98] sm:$0xff]  ;;  %p3576_p13 = pneg %p3575_p11  ;;  %p3581_p3 = scmp.lt.s32.totalorder %s3579_s16, %s3573_s23 }
  0x47   : > { %2203 = vmatprep.subr.bf16.mxu0 %v3178_v19  ;;  %2164 = vmatprep.subr.bf16.mxu1 %v3208_v24  ;;  %v600_v38 = vld [vmem:[#allocation3 + $0x480] sm:$0xff]  ;;  %v3273_v42 = vcombine.low %v585_v39, %v601_v41  ;;  %v3274_v43 = vcombine.high %v585_v39, %v601_v41  ;;  %v617_v47 = vld [vmem:[#allocation3 + $0x508] sm:$0xff]  ;;  %v3149_v12 = vcombine.low %v459_v8, %v475_v10  ;;  %v491_v33 = vld [vmem:[#allocation3 + $0x118] sm:$0xff] }
  0x48   : > { %v3272_v40 = vcombine.high %v584_v37, %v600_v38  ;;  %v3271_v44 = vcombine.low %v584_v37, %v600_v38  ;;  %v616_v45 = vld [vmem:[#allocation3 + $0x500] sm:$0xff]  ;;  %v633_v49 = vld [vmem:[#allocation3 + $0x588] sm:$0xff]  ;;  %v3150_v13 = vcombine.high %v459_v8, %v475_v10  ;;  %2233 = vmatprep.mubr.bf16.mxu0 %v3694_v14  ;;  %v522_v37 = vld [vmem:[#allocation3 + $0x210] sm:$0xff]  ;;  %p3582_p5 = por %p3581_p3, %p3580_p1 }
  0x49   : > { %v632_v46 = vld [vmem:[#allocation3 + $0x580] sm:$0xff]  ;;  %v3305_v50 = vcombine.low %v617_v47, %v633_v49  ;;  %v3306_v51 = vcombine.high %v617_v47, %v633_v49  ;;  %v649_v55 = vld [vmem:[#allocation3 + $0x608] sm:$0xff]  ;;  %v538_v38 = vld [vmem:[#allocation3 + $0x290] sm:$0xff] }
  0x4a   : > { %2204 = vmatpush1.bf16.msra.mxu0 %v3177_v18  ;;  %2165 = vmatpush1.bf16.msra.mxu1 %v3207_v28  ;;  %v3304_v48 = vcombine.high %v616_v45, %v632_v46  ;;  %v3303_v52 = vcombine.low %v616_v45, %v632_v46  ;;  %v648_v53 = vld [vmem:[#allocation3 + $0x600] sm:$0xff]  ;;  %v665_v57 = vld [vmem:[#allocation3 + $0x688] sm:$0xff]  ;;  %v539_v41 = vld [vmem:[#allocation3 + $0x298] sm:$0xff]  ;;  %p3583_p6 = pnand %p3582_p5, %p3576_p13 }
  0x4b   : > { %2205 = vmatprep.subr.bf16.mxu0 %v3210_v27  ;;  %2166 = vmatprep.subr.bf16.mxu1 %v3240_v32  ;;  %v664_v54 = vld [vmem:[#allocation3 + $0x680] sm:$0xff]  ;;  %v3337_v58 = vcombine.low %v649_v55, %v665_v57  ;;  %v3338_v59 = vcombine.high %v649_v55, %v665_v57  ;;  %v681_v63 = vld [vmem:[#allocation3 + $0x708] sm:$0xff]  ;;  %v506_v32 = vld [vmem:[#allocation3 + $0x190] sm:$0xff] }
  0x4c   : > { %v3336_v56 = vcombine.high %v648_v53, %v664_v54  ;;  %v3335_v60 = vcombine.low %v648_v53, %v664_v54  ;;  %v680_v61 = vld [vmem:[#allocation3 + $0x700] sm:$0xff]  ;;  %v697_v2 = vld [vmem:[#allocation3 + $0x788] sm:$0xff]  ;;  %v554_v46 = vld [vmem:[#allocation3 + $0x310] sm:$0xff] }
  0x4d   : > { %v696_v62 = vld [vmem:[#allocation3 + $0x780] sm:$0xff]  ;;  %v3369_v3 = vcombine.low %v681_v63, %v697_v2  ;;  %v3370_v4 = vcombine.high %v681_v63, %v697_v2  ;;  %v570_v47 = vld [vmem:[#allocation3 + $0x390] sm:$0xff]  ;;  %v571_v49 = vld [vmem:[#allocation3 + $0x398] sm:$0xff] }
  0x4e   : > { %2206 = vmatpush1.bf16.msra.mxu0 %v3209_v26  ;;  %2167 = vmatpush1.bf16.msra.mxu1 %v3239_v36  ;;  %v3368_v1 = vcombine.high %v680_v61, %v696_v62  ;;  %v3367_v5 = vcombine.low %v680_v61, %v696_v62  ;;  %v586_v54 = vld [vmem:[#allocation3 + $0x410] sm:$0xff]  ;;  %v603_v57 = vld [vmem:[#allocation3 + $0x498] sm:$0xff] }
  0x4f   : > { %2207 = vmatprep.subr.bf16.mxu0 %v3242_v35  ;;  %2168 = vmatprep.subr.bf16.mxu1 %v3272_v40  ;;  %v3180_v35 = vcombine.high %v490_v31, %v506_v32  ;;  %v523_v40 = vld [vmem:[#allocation3 + $0x218] sm:$0xff]  ;;  %v602_v55 = vld [vmem:[#allocation3 + $0x490] sm:$0xff] }
  0x50   : > { %v3214_v45 = vcombine.high %v523_v40, %v539_v41  ;;  %v618_v62 = vld [vmem:[#allocation3 + $0x510] sm:$0xff]  ;;  %v635_v2 = vld [vmem:[#allocation3 + $0x598] sm:$0xff] }
  0x51   : > { %v634_v63 = vld [vmem:[#allocation3 + $0x590] sm:$0xff]  ;;  %v667_v10 = vld [vmem:[#allocation3 + $0x698] sm:$0xff] }
  0x52   : > { %2208 = vmatpush1.bf16.msra.mxu0 %v3241_v34  ;;  %2169 = vmatpush1.bf16.msra.mxu1 %v3271_v44  ;;  %v507_v34 = vld [vmem:[#allocation3 + $0x198] sm:$0xff]  ;;  %v3212_v44 = vcombine.high %v522_v37, %v538_v38  ;;  %v666_v8 = vld [vmem:[#allocation3 + $0x690] sm:$0xff] }
  0x53   : > { %2209 = vmatprep.subr.bf16.mxu0 %v3274_v43  ;;  %2170 = vmatprep.subr.bf16.mxu1 %v3304_v48  ;;  %v3182_v36 = vcombine.high %v491_v33, %v507_v34  ;;  %v3181_v43 = vcombine.low %v491_v33, %v507_v34  ;;  %v555_v48 = vld [vmem:[#allocation3 + $0x318] sm:$0xff]  ;;  %v508_v33 = vld [vmem:[#allocation3 + $0x1a0] sm:$0xff]  ;;  %v493_v34 = vld [vmem:[#allocation3 + $0x128] sm:$0xff] }
  0x54   : > { %v3246_v53 = vcombine.high %v555_v48, %v571_v49 }
  0x56   : > { %2210 = vmatpush1.bf16.msra.mxu0 %v3273_v42  ;;  %2171 = vmatpush1.bf16.msra.mxu1 %v3303_v52  ;;  %v3179_v42 = vcombine.low %v490_v31, %v506_v32  ;;  %v3244_v52 = vcombine.high %v554_v46, %v570_v47  ;;  %v492_v32 = vld [vmem:[#allocation3 + $0x120] sm:$0xff] }
  0x57   : > { %2211 = vmatprep.subr.bf16.mxu0 %v3306_v51  ;;  %2172 = vmatprep.subr.bf16.mxu1 %v3336_v56  ;;  %v3213_v51 = vcombine.low %v523_v40, %v539_v41  ;;  %v587_v56 = vld [vmem:[#allocation3 + $0x418] sm:$0xff]  ;;  %v524_v41 = vld [vmem:[#allocation3 + $0x220] sm:$0xff] }
  0x58   : > { %v3278_v61 = vcombine.high %v587_v56, %v603_v57 }
  0x5a   : > { %2212 = vmatpush1.bf16.msra.mxu0 %v3305_v50  ;;  %2173 = vmatpush1.bf16.msra.mxu1 %v3335_v60  ;;  %v3211_v50 = vcombine.low %v522_v37, %v538_v38  ;;  %v3276_v60 = vcombine.high %v586_v54, %v602_v55  ;;  %v3184_v38 = vcombine.high %v492_v32, %v508_v33 }
  0x5b   : > { %2213 = vmatprep.subr.bf16.mxu0 %v3338_v59  ;;  %2174 = vmatprep.subr.bf16.mxu1 %v3368_v1  ;;  %v3245_v59 = vcombine.low %v555_v48, %v571_v49  ;;  %v619_v1 = vld [vmem:[#allocation3 + $0x518] sm:$0xff]  ;;  %v556_v49 = vld [vmem:[#allocation3 + $0x320] sm:$0xff] }
  0x5c   : > { %v3310_v6 = vcombine.high %v619_v1, %v635_v2 }
  0x5e   : > { %2214 = vmatpush1.bf16.msra.mxu0 %v3337_v58  ;;  %2175 = vmatpush1.bf16.msra.mxu1 %v3367_v5  ;;  %v3243_v58 = vcombine.low %v554_v46, %v570_v47  ;;  %v3308_v5 = vcombine.high %v618_v62, %v634_v63 }
  0x5f   : > { %2215 = vmatprep.subr.bf16.mxu0 %v3370_v4  ;;  %2242 = vmatprep.subr.bf16.mxu1 %v3148_v9  ;;  %v3277_v4 = vcombine.low %v587_v56, %v603_v57  ;;  %v651_v9 = vld [vmem:[#allocation3 + $0x618] sm:$0xff]  ;;  %v588_v57 = vld [vmem:[#allocation3 + $0x420] sm:$0xff] }
  0x62   : > { %2216 = vmatpush1.bf16.msra.mxu0 %v3369_v3  ;;  %v3275_v3 = vcombine.low %v586_v54, %v602_v55 }
  0x63   : > { %2283 = vmatprep.subr.bf16.mxu0 %v3150_v13  ;;  %v3340_v13 = vcombine.high %v650_v7, %v666_v8 }
 0x118   : > { %v438_v16 = vpop.f32.mrb[0].mxu0 }
 0x119   : > { %v439_v17 = vadd.f32 %v3139_v15, %v438_v16  ;;  %v3434_v18 = vpop.f32.mrb[1].mxu0  ;;  %v3342_v15 = vcombine.high %v651_v9, %v667_v10  ;;  %v682_v16 = vld [vmem:[#allocation3 + $0x710] sm:$0xff] }
 0x11a   : > { %v441_v19 = vpop.f32.mrb[2].mxu0  ;;  %v683_v18 = vld [vmem:[#allocation3 + $0x718] sm:$0xff] }
 0x11b   : > { %v445_v20 = vmul.f32 0.044715, %v439_v17  ;;  %v3435_v21 = vpop.f32.mrb[3].mxu0  ;;  %v444_v27 = vmul.f32 0.5, %v439_v17  ;;  %v699_v19 = vld [vmem:[#allocation3 + $0x798] sm:$0xff] }
 0x11c   : > { %v3341_v21 = vcombine.low %v651_v9, %v667_v10  ;;  %v652_v10 = vld [vmem:[#allocation3 + $0x620] sm:$0xff] }
 0x11d   : > { %v446_v22 = vmul.f32 %v445_v20, %v439_v17  ;;  %v3339_v20 = vcombine.low %v650_v7, %v666_v8 }
 0x11f   : > { %v447_v23 = vmul.f32 %v446_v22, %v439_v17 }
 0x121   : > { %v448_v24 = vadd.f32 %v447_v23, %v439_v17  ;;  %v698_v17 = vld [vmem:[#allocation3 + $0x790] sm:$0xff]  ;;  %v3374_v23 = vcombine.high %v683_v18, %v699_v19 }
 0x122   : > { %v3372_v22 = vcombine.high %v682_v16, %v698_v17 }
 0x123   : > { %v449_v25 = vmul.f32 0.7978846, %v448_v24  ;;  %v460_v24 = vld [vmem:[#allocation3 + $0x20] sm:$0xff] }
 0x125   : > { %3542 = vtanh.f32 %v449_v25  ;;  %v476_v25 = vld [vmem:[#allocation3 + $0xa0] sm:$0xff] }
 0x12f   : > { %v3543_v26 = vpop.eup %3542 }
 0x130   : > { %v451_v28 = vadd.f32 1.0, %v3543_v26  ;;  %v461_v26 = vld [vmem:[#allocation3 + $0x28] sm:$0xff] }
 0x132   : > { %v452_v29 = vmul.f32 %v451_v28, %v444_v27  ;;  %v477_v27 = vld [vmem:[#allocation3 + $0xa8] sm:$0xff]  ;;  %v3371_v28 = vcombine.low %v682_v16, %v698_v17 }
 0x133   : > { %v3154_v31 = vcombine.high %v461_v26, %v477_v27  ;;  %v3153_v37 = vcombine.low %v461_v26, %v477_v27  ;;  %v462_v27 = vld [vmem:[#allocation3 + $0x30] sm:$0xff] }
 0x134   : > { %v453_v30 = vpack.c.bf16 %v452_v29, %v452_v29  ;;  %v3373_v29 = vcombine.low %v683_v18, %v699_v19  ;;  %v684_v19 = vld [vmem:[#allocation3 + $0x720] sm:$0xff] }
 0x136   : > { %454 = vst [vmem:[#allocation2] sm:$0xf] %v453_v30  ;;  %v3152_v30 = vcombine.high %v460_v24, %v476_v25 }
 0x13d   : > { %v3856_v39 = vld [vmem:[#allocation2] sm:$0xf] }
 0x13e   : > { %2193 = vmatmul.mubr.bf16.vlgmr.msra.gmra.mrb[0].mxu1 %v3856_v39  ;;  %2234 = vmatmul.mubr.bf16.vlgmr.msra.gmra.mrb[4].mxu0 %v3856_v39 }
 0x13f   : > { %2243 = vmatpush1.bf16.msra.mxu1 %v3147_v11  ;;  %2284 = vmatpush1.bf16.msra.mxu0 %v3149_v12  ;;  %v3307_v11 = vcombine.low %v618_v62, %v634_v63  ;;  %v3309_v12 = vcombine.low %v619_v1, %v635_v2  ;;  %v620_v2 = vld [vmem:[#allocation3 + $0x520] sm:$0xff] }
 0x140   : > { %2244 = vmatprep.subr.bf16.mxu1 %v3180_v35  ;;  %2285 = vmatprep.subr.bf16.mxu0 %v3182_v36  ;;  %v509_v35 = vld [vmem:[#allocation3 + $0x1a8] sm:$0xff]  ;;  %v3151_v36 = vcombine.low %v460_v24, %v476_v25 }
 0x141   : > { %2274 = vmatprep.mubr.bf16.mxu1 %v3694_v14  ;;  %2315 = vmatprep.mubr.bf16.mxu0 %v3694_v14  ;;  %v3186_v40 = vcombine.high %v493_v34, %v509_v35  ;;  %v3185_v46 = vcombine.low %v493_v34, %v509_v35  ;;  %v494_v35 = vld [vmem:[#allocation3 + $0x130] sm:$0xff] }
 0x143   : > { %2245 = vmatpush1.bf16.msra.mxu1 %v3179_v42  ;;  %2286 = vmatpush1.bf16.msra.mxu0 %v3181_v43  ;;  %v540_v42 = vld [vmem:[#allocation3 + $0x2a0] sm:$0xff]  ;;  %v525_v43 = vld [vmem:[#allocation3 + $0x228] sm:$0xff] }
 0x144   : > { %2246 = vmatprep.subr.bf16.mxu1 %v3212_v44  ;;  %2287 = vmatprep.subr.bf16.mxu0 %v3214_v45  ;;  %v541_v44 = vld [vmem:[#allocation3 + $0x2a8] sm:$0xff]  ;;  %v3183_v45 = vcombine.low %v492_v32, %v508_v33  ;;  %v3216_v47 = vcombine.high %v524_v41, %v540_v42 }
 0x145   : > { %v3218_v48 = vcombine.high %v525_v43, %v541_v44  ;;  %v3217_v54 = vcombine.low %v525_v43, %v541_v44  ;;  %v526_v44 = vld [vmem:[#allocation3 + $0x230] sm:$0xff] }
 0x147   : > { %2247 = vmatpush1.bf16.msra.mxu1 %v3211_v50  ;;  %2288 = vmatpush1.bf16.msra.mxu0 %v3213_v51  ;;  %v572_v50 = vld [vmem:[#allocation3 + $0x3a0] sm:$0xff]  ;;  %v557_v51 = vld [vmem:[#allocation3 + $0x328] sm:$0xff] }
 0x148   : > { %2248 = vmatprep.subr.bf16.mxu1 %v3244_v52  ;;  %2289 = vmatprep.subr.bf16.mxu0 %v3246_v53  ;;  %v573_v52 = vld [vmem:[#allocation3 + $0x3a8] sm:$0xff]  ;;  %v3215_v53 = vcombine.low %v524_v41, %v540_v42  ;;  %v3248_v55 = vcombine.high %v556_v49, %v572_v50 }
 0x149   : > { %v3250_v56 = vcombine.high %v557_v51, %v573_v52  ;;  %v3249_v62 = vcombine.low %v557_v51, %v573_v52  ;;  %v558_v52 = vld [vmem:[#allocation3 + $0x330] sm:$0xff] }
 0x14b   : > { %2249 = vmatpush1.bf16.msra.mxu1 %v3243_v58  ;;  %2290 = vmatpush1.bf16.msra.mxu0 %v3245_v59  ;;  %v604_v58 = vld [vmem:[#allocation3 + $0x4a0] sm:$0xff]  ;;  %v589_v59 = vld [vmem:[#allocation3 + $0x428] sm:$0xff] }
 0x14c   : > { %2250 = vmatprep.subr.bf16.mxu1 %v3276_v60  ;;  %2291 = vmatprep.subr.bf16.mxu0 %v3278_v61  ;;  %v605_v60 = vld [vmem:[#allocation3 + $0x4a8] sm:$0xff]  ;;  %v3247_v61 = vcombine.low %v556_v49, %v572_v50  ;;  %v3280_v63 = vcombine.high %v588_v57, %v604_v58 }
 0x14d   : > { %v3282_v1 = vcombine.high %v589_v59, %v605_v60  ;;  %v3281_v7 = vcombine.low %v589_v59, %v605_v60  ;;  %v590_v60 = vld [vmem:[#allocation3 + $0x430] sm:$0xff] }
 0x14f   : > { %2251 = vmatpush1.bf16.msra.mxu1 %v3275_v3  ;;  %2292 = vmatpush1.bf16.msra.mxu0 %v3277_v4  ;;  %v636_v3 = vld [vmem:[#allocation3 + $0x5a0] sm:$0xff]  ;;  %v621_v4 = vld [vmem:[#allocation3 + $0x528] sm:$0xff] }
 0x150   : > { %2252 = vmatprep.subr.bf16.mxu1 %v3308_v5  ;;  %2293 = vmatprep.subr.bf16.mxu0 %v3310_v6  ;;  %v637_v5 = vld [vmem:[#allocation3 + $0x5a8] sm:$0xff]  ;;  %v3279_v6 = vcombine.low %v588_v57, %v604_v58  ;;  %v3312_v8 = vcombine.high %v620_v2, %v636_v3 }
 0x151   : > { %v3314_v9 = vcombine.high %v621_v4, %v637_v5  ;;  %v3313_v16 = vcombine.low %v621_v4, %v637_v5  ;;  %v622_v5 = vld [vmem:[#allocation3 + $0x530] sm:$0xff] }
 0x153   : > { %2253 = vmatpush1.bf16.msra.mxu1 %v3307_v11  ;;  %2294 = vmatpush1.bf16.msra.mxu0 %v3309_v12  ;;  %v668_v11 = vld [vmem:[#allocation3 + $0x6a0] sm:$0xff]  ;;  %v653_v12 = vld [vmem:[#allocation3 + $0x628] sm:$0xff] }
 0x154   : > { %2254 = vmatprep.subr.bf16.mxu1 %v3340_v13  ;;  %2295 = vmatprep.subr.bf16.mxu0 %v3342_v15  ;;  %v669_v13 = vld [vmem:[#allocation3 + $0x6a8] sm:$0xff]  ;;  %v3311_v15 = vcombine.low %v620_v2, %v636_v3  ;;  %v3344_v17 = vcombine.high %v652_v10, %v668_v11 }
 0x155   : > { %v3346_v18 = vcombine.high %v653_v12, %v669_v13  ;;  %v3345_v24 = vcombine.low %v653_v12, %v669_v13  ;;  %v654_v13 = vld [vmem:[#allocation3 + $0x630] sm:$0xff] }
 0x157   : > { %2255 = vmatpush1.bf16.msra.mxu1 %v3339_v20  ;;  %2296 = vmatpush1.bf16.msra.mxu0 %v3341_v21  ;;  %v700_v20 = vld [vmem:[#allocation3 + $0x7a0] sm:$0xff]  ;;  %v685_v21 = vld [vmem:[#allocation3 + $0x728] sm:$0xff] }
 0x158   : > { %2256 = vmatprep.subr.bf16.mxu1 %v3372_v22  ;;  %2297 = vmatprep.subr.bf16.mxu0 %v3374_v23  ;;  %v701_v22 = vld [vmem:[#allocation3 + $0x7a8] sm:$0xff]  ;;  %v3343_v23 = vcombine.low %v652_v10, %v668_v11  ;;  %v3376_v25 = vcombine.high %v684_v19, %v700_v20 }
 0x159   : > { %v3378_v26 = vcombine.high %v685_v21, %v701_v22  ;;  %v3377_v32 = vcombine.low %v685_v21, %v701_v22  ;;  %v686_v22 = vld [vmem:[#allocation3 + $0x730] sm:$0xff] }
 0x15b   : > { %2257 = vmatpush1.bf16.msra.mxu1 %v3371_v28  ;;  %2298 = vmatpush1.bf16.msra.mxu0 %v3373_v29  ;;  %v478_v28 = vld [vmem:[#allocation3 + $0xb0] sm:$0xff]  ;;  %v463_v29 = vld [vmem:[#allocation3 + $0x38] sm:$0xff] }
 0x15c   : > { %2324 = vmatprep.subr.bf16.mxu1 %v3152_v30  ;;  %2365 = vmatprep.subr.bf16.mxu0 %v3154_v31  ;;  %v479_v30 = vld [vmem:[#allocation3 + $0xb8] sm:$0xff]  ;;  %v3375_v31 = vcombine.low %v684_v19, %v700_v20  ;;  %v3156_v33 = vcombine.high %v462_v27, %v478_v28 }
 0x15d   : > { %v3158_v34 = vcombine.high %v463_v29, %v479_v30  ;;  %v3157_v41 = vcombine.low %v463_v29, %v479_v30  ;;  %v464_v30 = vld [vmem:[#allocation3 + $0x40] sm:$0xff] }
 0x15e   : > { %2275 = vmatmul.mubr.bf16.vlgmr.msra.gmra.mrb[4].mxu1 %v3856_v39  ;;  %2316 = vmatmul.mubr.bf16.vlgmr.msra.gmra.mrb[8].mxu0 %v3856_v39 }
 0x15f   : > { %2325 = vmatpush1.bf16.msra.mxu1 %v3151_v36  ;;  %2366 = vmatpush1.bf16.msra.mxu0 %v3153_v37  ;;  %v510_v36 = vld [vmem:[#allocation3 + $0x1b0] sm:$0xff]  ;;  %v495_v37 = vld [vmem:[#allocation3 + $0x138] sm:$0xff] }
 0x160   : > { %2326 = vmatprep.subr.bf16.mxu1 %v3184_v38  ;;  %2367 = vmatprep.subr.bf16.mxu0 %v3186_v40  ;;  %v511_v38 = vld [vmem:[#allocation3 + $0x1b8] sm:$0xff]  ;;  %v3155_v40 = vcombine.low %v462_v27, %v478_v28  ;;  %v3188_v42 = vcombine.high %v494_v35, %v510_v36 }
 0x161   : > { %2356 = vmatprep.mubr.bf16.mxu1 %v3694_v14  ;;  %2397 = vmatprep.mubr.bf16.mxu0 %v3694_v14  ;;  %v3190_v43 = vcombine.high %v495_v37, %v511_v38  ;;  %v3189_v49 = vcombine.low %v495_v37, %v511_v38  ;;  %v496_v38 = vld [vmem:[#allocation3 + $0x140] sm:$0xff] }
 0x163   : > { %2327 = vmatpush1.bf16.msra.mxu1 %v3183_v45  ;;  %2368 = vmatpush1.bf16.msra.mxu0 %v3185_v46  ;;  %v542_v45 = vld [vmem:[#allocation3 + $0x2b0] sm:$0xff]  ;;  %v527_v46 = vld [vmem:[#allocation3 + $0x238] sm:$0xff] }
 0x164   : > { %2328 = vmatprep.subr.bf16.mxu1 %v3216_v47  ;;  %2369 = vmatprep.subr.bf16.mxu0 %v3218_v48  ;;  %v543_v47 = vld [vmem:[#allocation3 + $0x2b8] sm:$0xff]  ;;  %v3187_v48 = vcombine.low %v494_v35, %v510_v36  ;;  %v3220_v50 = vcombine.high %v526_v44, %v542_v45 }
 0x165   : > { %v3222_v51 = vcombine.high %v527_v46, %v543_v47  ;;  %v3221_v57 = vcombine.low %v527_v46, %v543_v47  ;;  %v528_v47 = vld [vmem:[#allocation3 + $0x240] sm:$0xff] }
 0x167   : > { %2329 = vmatpush1.bf16.msra.mxu1 %v3215_v53  ;;  %2370 = vmatpush1.bf16.msra.mxu0 %v3217_v54  ;;  %v574_v53 = vld [vmem:[#allocation3 + $0x3b0] sm:$0xff]  ;;  %v559_v54 = vld [vmem:[#allocation3 + $0x338] sm:$0xff] }
 0x168   : > { %2330 = vmatprep.subr.bf16.mxu1 %v3248_v55  ;;  %2371 = vmatprep.subr.bf16.mxu0 %v3250_v56  ;;  %v575_v55 = vld [vmem:[#allocation3 + $0x3b8] sm:$0xff]  ;;  %v3219_v56 = vcombine.low %v526_v44, %v542_v45  ;;  %v3252_v58 = vcombine.high %v558_v52, %v574_v53 }
 0x169   : > { %v3254_v59 = vcombine.high %v559_v54, %v575_v55  ;;  %v3253_v2 = vcombine.low %v559_v54, %v575_v55  ;;  %v560_v55 = vld [vmem:[#allocation3 + $0x340] sm:$0xff] }
 0x16b   : > { %2331 = vmatpush1.bf16.msra.mxu1 %v3247_v61  ;;  %2372 = vmatpush1.bf16.msra.mxu0 %v3249_v62  ;;  %v606_v61 = vld [vmem:[#allocation3 + $0x4b0] sm:$0xff]  ;;  %v591_v62 = vld [vmem:[#allocation3 + $0x438] sm:$0xff] }
 0x16c   : > { %2332 = vmatprep.subr.bf16.mxu1 %v3280_v63  ;;  %2373 = vmatprep.subr.bf16.mxu0 %v3282_v1  ;;  %v607_v63 = vld [vmem:[#allocation3 + $0x4b8] sm:$0xff]  ;;  %v3251_v1 = vcombine.low %v558_v52, %v574_v53  ;;  %v3284_v3 = vcombine.high %v590_v60, %v606_v61 }
 0x16d   : > { %v3286_v4 = vcombine.high %v591_v62, %v607_v63  ;;  %v3285_v10 = vcombine.low %v591_v62, %v607_v63  ;;  %v592_v63 = vld [vmem:[#allocation3 + $0x440] sm:$0xff] }
 0x16f   : > { %2333 = vmatpush1.bf16.msra.mxu1 %v3279_v6  ;;  %2374 = vmatpush1.bf16.msra.mxu0 %v3281_v7  ;;  %v638_v6 = vld [vmem:[#allocation3 + $0x5b0] sm:$0xff]  ;;  %v623_v7 = vld [vmem:[#allocation3 + $0x538] sm:$0xff] }
 0x170   : > { %2334 = vmatprep.subr.bf16.mxu1 %v3312_v8  ;;  %2375 = vmatprep.subr.bf16.mxu0 %v3314_v9  ;;  %v639_v8 = vld [vmem:[#allocation3 + $0x5b8] sm:$0xff]  ;;  %v3283_v9 = vcombine.low %v590_v60, %v606_v61  ;;  %v3316_v11 = vcombine.high %v622_v5, %v638_v6 }
 0x171   : > { %v3318_v12 = vcombine.high %v623_v7, %v639_v8  ;;  %v3317_v19 = vcombine.low %v623_v7, %v639_v8  ;;  %v624_v8 = vld [vmem:[#allocation3 + $0x540] sm:$0xff] }
 0x173   : > { %2335 = vmatpush1.bf16.msra.mxu1 %v3311_v15  ;;  %2376 = vmatpush1.bf16.msra.mxu0 %v3313_v16  ;;  %v670_v15 = vld [vmem:[#allocation3 + $0x6b0] sm:$0xff]  ;;  %v655_v16 = vld [vmem:[#allocation3 + $0x638] sm:$0xff] }
 0x174   : > { %2336 = vmatprep.subr.bf16.mxu1 %v3344_v17  ;;  %2377 = vmatprep.subr.bf16.mxu0 %v3346_v18  ;;  %v671_v17 = vld [vmem:[#allocation3 + $0x6b8] sm:$0xff]  ;;  %v3315_v18 = vcombine.low %v622_v5, %v638_v6  ;;  %v3348_v20 = vcombine.high %v654_v13, %v670_v15 }
 0x175   : > { %v3350_v21 = vcombine.high %v655_v16, %v671_v17  ;;  %v3349_v27 = vcombine.low %v655_v16, %v671_v17  ;;  %v656_v17 = vld [vmem:[#allocation3 + $0x640] sm:$0xff] }
 0x177   : > { %2337 = vmatpush1.bf16.msra.mxu1 %v3343_v23  ;;  %2378 = vmatpush1.bf16.msra.mxu0 %v3345_v24  ;;  %v702_v23 = vld [vmem:[#allocation3 + $0x7b0] sm:$0xff]  ;;  %v687_v24 = vld [vmem:[#allocation3 + $0x738] sm:$0xff] }
 0x178   : > { %2338 = vmatprep.subr.bf16.mxu1 %v3376_v25  ;;  %2379 = vmatprep.subr.bf16.mxu0 %v3378_v26  ;;  %v703_v25 = vld [vmem:[#allocation3 + $0x7b8] sm:$0xff]  ;;  %v3347_v26 = vcombine.low %v654_v13, %v670_v15  ;;  %v3380_v28 = vcombine.high %v686_v22, %v702_v23 }
 0x179   : > { %v3382_v29 = vcombine.high %v687_v24, %v703_v25  ;;  %v3381_v35 = vcombine.low %v687_v24, %v703_v25  ;;  %v688_v25 = vld [vmem:[#allocation3 + $0x740] sm:$0xff] }
 0x17b   : > { %2339 = vmatpush1.bf16.msra.mxu1 %v3375_v31  ;;  %2380 = vmatpush1.bf16.msra.mxu0 %v3377_v32  ;;  %v480_v31 = vld [vmem:[#allocation3 + $0xc0] sm:$0xff]  ;;  %v465_v32 = vld [vmem:[#allocation3 + $0x48] sm:$0xff] }
 0x17c   : > { %2406 = vmatprep.subr.bf16.mxu1 %v3156_v33  ;;  %2447 = vmatprep.subr.bf16.mxu0 %v3158_v34  ;;  %v481_v33 = vld [vmem:[#allocation3 + $0xc8] sm:$0xff]  ;;  %v3379_v34 = vcombine.low %v686_v22, %v702_v23  ;;  %v3160_v36 = vcombine.high %v464_v30, %v480_v31 }
 0x17d   : > { %v3162_v37 = vcombine.high %v465_v32, %v481_v33  ;;  %v3161_v44 = vcombine.low %v465_v32, %v481_v33  ;;  %v466_v33 = vld [vmem:[#allocation3 + $0x50] sm:$0xff] }
 0x17e   : > { %2357 = vmatmul.mubr.bf16.vlgmr.msra.gmra.mrb[8].mxu1 %v3856_v39  ;;  %2398 = vmatmul.mubr.bf16.vlgmr.msra.gmra.mrb[12].mxu0 %v3856_v39 }
 0x17f   : > { %2407 = vmatpush1.bf16.msra.mxu1 %v3155_v40  ;;  %2448 = vmatpush1.bf16.msra.mxu0 %v3157_v41  ;;  %v512_v40 = vld [vmem:[#allocation3 + $0x1c0] sm:$0xff]  ;;  %v497_v41 = vld [vmem:[#allocation3 + $0x148] sm:$0xff] }
 0x180   : > { %2408 = vmatprep.subr.bf16.mxu1 %v3188_v42  ;;  %2449 = vmatprep.subr.bf16.mxu0 %v3190_v43  ;;  %v513_v42 = vld [vmem:[#allocation3 + $0x1c8] sm:$0xff]  ;;  %v3159_v43 = vcombine.low %v464_v30, %v480_v31  ;;  %v3192_v45 = vcombine.high %v496_v38, %v512_v40 }
 0x181   : > { %2438 = vmatprep.mubr.bf16.mxu1 %v3694_v14  ;;  %2479 = vmatprep.mubr.bf16.mxu0 %v3694_v14  ;;  %v3194_v46 = vcombine.high %v497_v41, %v513_v42  ;;  %v3193_v52 = vcombine.low %v497_v41, %v513_v42  ;;  %v498_v42 = vld [vmem:[#allocation3 + $0x150] sm:$0xff] }
 0x183   : > { %2409 = vmatpush1.bf16.msra.mxu1 %v3187_v48  ;;  %2450 = vmatpush1.bf16.msra.mxu0 %v3189_v49  ;;  %v544_v48 = vld [vmem:[#allocation3 + $0x2c0] sm:$0xff]  ;;  %v529_v49 = vld [vmem:[#allocation3 + $0x248] sm:$0xff] }
 0x184   : > { %2410 = vmatprep.subr.bf16.mxu1 %v3220_v50  ;;  %2451 = vmatprep.subr.bf16.mxu0 %v3222_v51  ;;  %v545_v50 = vld [vmem:[#allocation3 + $0x2c8] sm:$0xff]  ;;  %v3191_v51 = vcombine.low %v496_v38, %v512_v40  ;;  %v3224_v53 = vcombine.high %v528_v47, %v544_v48 }
 0x185   : > { %v3226_v54 = vcombine.high %v529_v49, %v545_v50  ;;  %v3225_v60 = vcombine.low %v529_v49, %v545_v50  ;;  %v530_v50 = vld [vmem:[#allocation3 + $0x250] sm:$0xff] }
 0x187   : > { %2411 = vmatpush1.bf16.msra.mxu1 %v3219_v56  ;;  %2452 = vmatpush1.bf16.msra.mxu0 %v3221_v57  ;;  %v576_v56 = vld [vmem:[#allocation3 + $0x3c0] sm:$0xff]  ;;  %v561_v57 = vld [vmem:[#allocation3 + $0x348] sm:$0xff] }
 0x188   : > { %2412 = vmatprep.subr.bf16.mxu1 %v3252_v58  ;;  %2453 = vmatprep.subr.bf16.mxu0 %v3254_v59  ;;  %v577_v58 = vld [vmem:[#allocation3 + $0x3c8] sm:$0xff]  ;;  %v3223_v59 = vcombine.low %v528_v47, %v544_v48  ;;  %v3256_v61 = vcombine.high %v560_v55, %v576_v56 }
 0x189   : > { %v3258_v62 = vcombine.high %v561_v57, %v577_v58  ;;  %v3257_v5 = vcombine.low %v561_v57, %v577_v58  ;;  %v562_v58 = vld [vmem:[#allocation3 + $0x350] sm:$0xff] }
 0x18b   : > { %2413 = vmatpush1.bf16.msra.mxu1 %v3251_v1  ;;  %2454 = vmatpush1.bf16.msra.mxu0 %v3253_v2  ;;  %v608_v1 = vld [vmem:[#allocation3 + $0x4c0] sm:$0xff]  ;;  %v593_v2 = vld [vmem:[#allocation3 + $0x448] sm:$0xff] }
 0x18c   : > { %2414 = vmatprep.subr.bf16.mxu1 %v3284_v3  ;;  %2455 = vmatprep.subr.bf16.mxu0 %v3286_v4  ;;  %v609_v3 = vld [vmem:[#allocation3 + $0x4c8] sm:$0xff]  ;;  %v3255_v4 = vcombine.low %v560_v55, %v576_v56  ;;  %v3288_v6 = vcombine.high %v592_v63, %v608_v1 }
 0x18d   : > { %v3290_v7 = vcombine.high %v593_v2, %v609_v3  ;;  %v3289_v13 = vcombine.low %v593_v2, %v609_v3  ;;  %v594_v3 = vld [vmem:[#allocation3 + $0x450] sm:$0xff] }
 0x18f   : > { %2415 = vmatpush1.bf16.msra.mxu1 %v3283_v9  ;;  %2456 = vmatpush1.bf16.msra.mxu0 %v3285_v10  ;;  %v640_v9 = vld [vmem:[#allocation3 + $0x5c0] sm:$0xff]  ;;  %v625_v10 = vld [vmem:[#allocation3 + $0x548] sm:$0xff] }
 0x190   : > { %2416 = vmatprep.subr.bf16.mxu1 %v3316_v11  ;;  %2457 = vmatprep.subr.bf16.mxu0 %v3318_v12  ;;  %v641_v11 = vld [vmem:[#allocation3 + $0x5c8] sm:$0xff]  ;;  %v3287_v12 = vcombine.low %v592_v63, %v608_v1  ;;  %v3320_v15 = vcombine.high %v624_v8, %v640_v9 }
 0x191   : > { %v3322_v16 = vcombine.high %v625_v10, %v641_v11  ;;  %v3321_v22 = vcombine.low %v625_v10, %v641_v11  ;;  %v626_v11 = vld [vmem:[#allocation3 + $0x550] sm:$0xff] }
 0x193   : > { %2417 = vmatpush1.bf16.msra.mxu1 %v3315_v18  ;;  %2458 = vmatpush1.bf16.msra.mxu0 %v3317_v19  ;;  %v672_v18 = vld [vmem:[#allocation3 + $0x6c0] sm:$0xff]  ;;  %v657_v19 = vld [vmem:[#allocation3 + $0x648] sm:$0xff] }
 0x194   : > { %2418 = vmatprep.subr.bf16.mxu1 %v3348_v20  ;;  %2459 = vmatprep.subr.bf16.mxu0 %v3350_v21  ;;  %v673_v20 = vld [vmem:[#allocation3 + $0x6c8] sm:$0xff]  ;;  %v3319_v21 = vcombine.low %v624_v8, %v640_v9  ;;  %v3352_v23 = vcombine.high %v656_v17, %v672_v18 }
 0x195   : > { %v3354_v24 = vcombine.high %v657_v19, %v673_v20  ;;  %v3353_v30 = vcombine.low %v657_v19, %v673_v20  ;;  %v658_v20 = vld [vmem:[#allocation3 + $0x650] sm:$0xff] }
 0x197   : > { %2419 = vmatpush1.bf16.msra.mxu1 %v3347_v26  ;;  %2460 = vmatpush1.bf16.msra.mxu0 %v3349_v27  ;;  %v704_v26 = vld [vmem:[#allocation3 + $0x7c0] sm:$0xff]  ;;  %v689_v27 = vld [vmem:[#allocation3 + $0x748] sm:$0xff] }
 0x198   : > { %2420 = vmatprep.subr.bf16.mxu1 %v3380_v28  ;;  %2461 = vmatprep.subr.bf16.mxu0 %v3382_v29  ;;  %v705_v28 = vld [vmem:[#allocation3 + $0x7c8] sm:$0xff]  ;;  %v3351_v29 = vcombine.low %v656_v17, %v672_v18  ;;  %v3384_v31 = vcombine.high %v688_v25, %v704_v26 }
 0x199   : > { %v3386_v32 = vcombine.high %v689_v27, %v705_v28  ;;  %v3385_v38 = vcombine.low %v689_v27, %v705_v28  ;;  %v690_v28 = vld [vmem:[#allocation3 + $0x750] sm:$0xff] }
 0x19b   : > { %2421 = vmatpush1.bf16.msra.mxu1 %v3379_v34  ;;  %2462 = vmatpush1.bf16.msra.mxu0 %v3381_v35  ;;  %v482_v34 = vld [vmem:[#allocation3 + $0xd0] sm:$0xff]  ;;  %v467_v35 = vld [vmem:[#allocation3 + $0x58] sm:$0xff] }
 0x19c   : > { %2488 = vmatprep.subr.bf16.mxu1 %v3160_v36  ;;  %2529 = vmatprep.subr.bf16.mxu0 %v3162_v37  ;;  %v483_v36 = vld [vmem:[#allocation3 + $0xd8] sm:$0xff]  ;;  %v3383_v37 = vcombine.low %v688_v25, %v704_v26  ;;  %v3164_v40 = vcombine.high %v466_v33, %v482_v34 }
 0x19d   : > { %v3166_v41 = vcombine.high %v467_v35, %v483_v36  ;;  %v3165_v47 = vcombine.low %v467_v35, %v483_v36  ;;  %v468_v36 = vld [vmem:[#allocation3 + $0x60] sm:$0xff] }
 0x19e   : > { %2439 = vmatmul.mubr.bf16.vlgmr.msra.gmra.mrb[12].mxu1 %v3856_v39  ;;  %2480 = vmatmul.mubr.bf16.vlgmr.msra.gmra.mrb[16].mxu0 %v3856_v39 }
 0x19f   : > { %2489 = vmatpush1.bf16.msra.mxu1 %v3159_v43  ;;  %2530 = vmatpush1.bf16.msra.mxu0 %v3161_v44  ;;  %v514_v43 = vld [vmem:[#allocation3 + $0x1d0] sm:$0xff]  ;;  %v499_v44 = vld [vmem:[#allocation3 + $0x158] sm:$0xff] }
 0x1a0   : > { %2490 = vmatprep.subr.bf16.mxu1 %v3192_v45  ;;  %2531 = vmatprep.subr.bf16.mxu0 %v3194_v46  ;;  %v515_v45 = vld [vmem:[#allocation3 + $0x1d8] sm:$0xff]  ;;  %v3163_v46 = vcombine.low %v466_v33, %v482_v34  ;;  %v3196_v48 = vcombine.high %v498_v42, %v514_v43 }
 0x1a1   : > { %2520 = vmatprep.mubr.bf16.mxu1 %v3694_v14  ;;  %2561 = vmatprep.mubr.bf16.mxu0 %v3694_v14  ;;  %v3198_v49 = vcombine.high %v499_v44, %v515_v45  ;;  %v3197_v55 = vcombine.low %v499_v44, %v515_v45  ;;  %v500_v45 = vld [vmem:[#allocation3 + $0x160] sm:$0xff] }
 0x1a3   : > { %2491 = vmatpush1.bf16.msra.mxu1 %v3191_v51  ;;  %2532 = vmatpush1.bf16.msra.mxu0 %v3193_v52  ;;  %v546_v51 = vld [vmem:[#allocation3 + $0x2d0] sm:$0xff]  ;;  %v531_v52 = vld [vmem:[#allocation3 + $0x258] sm:$0xff] }
 0x1a4   : > { %2492 = vmatprep.subr.bf16.mxu1 %v3224_v53  ;;  %2533 = vmatprep.subr.bf16.mxu0 %v3226_v54  ;;  %v547_v53 = vld [vmem:[#allocation3 + $0x2d8] sm:$0xff]  ;;  %v3195_v54 = vcombine.low %v498_v42, %v514_v43  ;;  %v3228_v56 = vcombine.high %v530_v50, %v546_v51 }
 0x1a5   : > { %v3230_v57 = vcombine.high %v531_v52, %v547_v53  ;;  %v3229_v63 = vcombine.low %v531_v52, %v547_v53  ;;  %v532_v53 = vld [vmem:[#allocation3 + $0x260] sm:$0xff] }
 0x1a7   : > { %2493 = vmatpush1.bf16.msra.mxu1 %v3223_v59  ;;  %2534 = vmatpush1.bf16.msra.mxu0 %v3225_v60  ;;  %v578_v59 = vld [vmem:[#allocation3 + $0x3d0] sm:$0xff]  ;;  %v563_v60 = vld [vmem:[#allocation3 + $0x358] sm:$0xff] }
 0x1a8   : > { %2494 = vmatprep.subr.bf16.mxu1 %v3256_v61  ;;  %2535 = vmatprep.subr.bf16.mxu0 %v3258_v62  ;;  %v579_v61 = vld [vmem:[#allocation3 + $0x3d8] sm:$0xff]  ;;  %v3227_v62 = vcombine.low %v530_v50, %v546_v51  ;;  %v3260_v1 = vcombine.high %v562_v58, %v578_v59 }
 0x1a9   : > { %v3262_v2 = vcombine.high %v563_v60, %v579_v61  ;;  %v3261_v8 = vcombine.low %v563_v60, %v579_v61  ;;  %v564_v61 = vld [vmem:[#allocation3 + $0x360] sm:$0xff] }
 0x1ab   : > { %2495 = vmatpush1.bf16.msra.mxu1 %v3255_v4  ;;  %2536 = vmatpush1.bf16.msra.mxu0 %v3257_v5  ;;  %v610_v4 = vld [vmem:[#allocation3 + $0x4d0] sm:$0xff]  ;;  %v595_v5 = vld [vmem:[#allocation3 + $0x458] sm:$0xff] }
 0x1ac   : > { %2496 = vmatprep.subr.bf16.mxu1 %v3288_v6  ;;  %2537 = vmatprep.subr.bf16.mxu0 %v3290_v7  ;;  %v611_v6 = vld [vmem:[#allocation3 + $0x4d8] sm:$0xff]  ;;  %v3259_v7 = vcombine.low %v562_v58, %v578_v59  ;;  %v3292_v9 = vcombine.high %v594_v3, %v610_v4 }
 0x1ad   : > { %v3294_v10 = vcombine.high %v595_v5, %v611_v6  ;;  %v3293_v17 = vcombine.low %v595_v5, %v611_v6  ;;  %v596_v5 = vld [vmem:[#allocation3 + $0x460] sm:$0xff] }
 0x1ae   : > { %v612_v6 = vld [vmem:[#allocation3 + $0x4e0] sm:$0xff] }
 0x1af   : > { %2497 = vmatpush1.bf16.msra.mxu1 %v3287_v12  ;;  %2538 = vmatpush1.bf16.msra.mxu0 %v3289_v13  ;;  %v642_v12 = vld [vmem:[#allocation3 + $0x5d0] sm:$0xff]  ;;  %v627_v13 = vld [vmem:[#allocation3 + $0x558] sm:$0xff] }
 0x1b0   : > { %2498 = vmatprep.subr.bf16.mxu1 %v3320_v15  ;;  %2539 = vmatprep.subr.bf16.mxu0 %v3322_v16  ;;  %v643_v15 = vld [vmem:[#allocation3 + $0x5d8] sm:$0xff]  ;;  %v3291_v16 = vcombine.low %v594_v3, %v610_v4  ;;  %v3324_v18 = vcombine.high %v626_v11, %v642_v12 }
 0x1b1   : > { %v3326_v19 = vcombine.high %v627_v13, %v643_v15  ;;  %v3325_v25 = vcombine.low %v627_v13, %v643_v15  ;;  %v628_v13 = vld [vmem:[#allocation3 + $0x560] sm:$0xff] }
 0x1b2   : > { %v644_v15 = vld [vmem:[#allocation3 + $0x5e0] sm:$0xff] }
 0x1b3   : > { %2499 = vmatpush1.bf16.msra.mxu1 %v3319_v21  ;;  %2540 = vmatpush1.bf16.msra.mxu0 %v3321_v22  ;;  %v674_v21 = vld [vmem:[#allocation3 + $0x6d0] sm:$0xff]  ;;  %v659_v22 = vld [vmem:[#allocation3 + $0x658] sm:$0xff] }
 0x1b4   : > { %2500 = vmatprep.subr.bf16.mxu1 %v3352_v23  ;;  %2541 = vmatprep.subr.bf16.mxu0 %v3354_v24  ;;  %v675_v23 = vld [vmem:[#allocation3 + $0x6d8] sm:$0xff]  ;;  %v3323_v24 = vcombine.low %v626_v11, %v642_v12  ;;  %v3356_v26 = vcombine.high %v658_v20, %v674_v21  ;;  %v3296_v11 = vcombine.high %v596_v5, %v612_v6 }
 0x1b5   : > { %v3358_v27 = vcombine.high %v659_v22, %v675_v23  ;;  %v3357_v33 = vcombine.low %v659_v22, %v675_v23  ;;  %v660_v22 = vld [vmem:[#allocation3 + $0x660] sm:$0xff] }
 0x1b6   : > { %v676_v23 = vld [vmem:[#allocation3 + $0x6e0] sm:$0xff] }
 0x1b7   : > { %2501 = vmatpush1.bf16.msra.mxu1 %v3351_v29  ;;  %2542 = vmatpush1.bf16.msra.mxu0 %v3353_v30  ;;  %v706_v29 = vld [vmem:[#allocation3 + $0x7d0] sm:$0xff]  ;;  %v691_v30 = vld [vmem:[#allocation3 + $0x758] sm:$0xff] }
 0x1b8   : > { %2502 = vmatprep.subr.bf16.mxu1 %v3384_v31  ;;  %2543 = vmatprep.subr.bf16.mxu0 %v3386_v32  ;;  %v707_v31 = vld [vmem:[#allocation3 + $0x7d8] sm:$0xff]  ;;  %v3355_v32 = vcombine.low %v658_v20, %v674_v21  ;;  %v3388_v34 = vcombine.high %v690_v28, %v706_v29  ;;  %v3328_v20 = vcombine.high %v628_v13, %v644_v15 }
 0x1b9   : > { %v3390_v35 = vcombine.high %v691_v30, %v707_v31  ;;  %v3389_v42 = vcombine.low %v691_v30, %v707_v31  ;;  %v692_v30 = vld [vmem:[#allocation3 + $0x760] sm:$0xff] }
 0x1ba   : > { %v708_v31 = vld [vmem:[#allocation3 + $0x7e0] sm:$0xff] }
 0x1bb   : > { %2503 = vmatpush1.bf16.msra.mxu1 %v3383_v37  ;;  %2544 = vmatpush1.bf16.msra.mxu0 %v3385_v38  ;;  %v484_v37 = vld [vmem:[#allocation3 + $0xe0] sm:$0xff]  ;;  %v469_v38 = vld [vmem:[#allocation3 + $0x68] sm:$0xff] }
 0x1bc   : > { %2570 = vmatprep.subr.bf16.mxu1 %v3164_v40  ;;  %2611 = vmatprep.subr.bf16.mxu0 %v3166_v41  ;;  %v485_v40 = vld [vmem:[#allocation3 + $0xe8] sm:$0xff]  ;;  %v3387_v41 = vcombine.low %v690_v28, %v706_v29  ;;  %v3168_v43 = vcombine.high %v468_v36, %v484_v37  ;;  %v3360_v28 = vcombine.high %v660_v22, %v676_v23 }
 0x1bd   : > { %v3170_v44 = vcombine.high %v469_v38, %v485_v40  ;;  %v3169_v50 = vcombine.low %v469_v38, %v485_v40  ;;  %v470_v38 = vld [vmem:[#allocation3 + $0x70] sm:$0xff] }
 0x1be   : > { %2521 = vmatmul.mubr.bf16.vlgmr.msra.gmra.mrb[16].mxu1 %v3856_v39  ;;  %2562 = vmatmul.mubr.bf16.vlgmr.msra.gmra.mrb[20].mxu0 %v3856_v39  ;;  %v486_v40 = vld [vmem:[#allocation3 + $0xf0] sm:$0xff] }
 0x1bf   : > { %2571 = vmatpush1.bf16.msra.mxu1 %v3163_v46  ;;  %2612 = vmatpush1.bf16.msra.mxu0 %v3165_v47  ;;  %v516_v46 = vld [vmem:[#allocation3 + $0x1e0] sm:$0xff]  ;;  %v501_v47 = vld [vmem:[#allocation3 + $0x168] sm:$0xff] }
 0x1c0   : > { %2572 = vmatprep.subr.bf16.mxu1 %v3196_v48  ;;  %2613 = vmatprep.subr.bf16.mxu0 %v3198_v49  ;;  %v517_v48 = vld [vmem:[#allocation3 + $0x1e8] sm:$0xff]  ;;  %v3167_v49 = vcombine.low %v468_v36, %v484_v37  ;;  %v3200_v51 = vcombine.high %v500_v45, %v516_v46  ;;  %v3392_v36 = vcombine.high %v692_v30, %v708_v31 }
 0x1c1   : > { %2602 = vmatprep.mubr.bf16.mxu1 %v3694_v14  ;;  %2643 = vmatprep.mubr.bf16.mxu0 %v3694_v14  ;;  %v3202_v52 = vcombine.high %v501_v47, %v517_v48  ;;  %v3201_v58 = vcombine.low %v501_v47, %v517_v48  ;;  %v502_v47 = vld [vmem:[#allocation3 + $0x170] sm:$0xff] }
 0x1c2   : > { %v518_v48 = vld [vmem:[#allocation3 + $0x1f0] sm:$0xff] }
 0x1c3   : > { %2573 = vmatpush1.bf16.msra.mxu1 %v3195_v54  ;;  %2614 = vmatpush1.bf16.msra.mxu0 %v3197_v55  ;;  %v548_v54 = vld [vmem:[#allocation3 + $0x2e0] sm:$0xff]  ;;  %v533_v55 = vld [vmem:[#allocation3 + $0x268] sm:$0xff] }
 0x1c4   : > { %2574 = vmatprep.subr.bf16.mxu1 %v3228_v56  ;;  %2615 = vmatprep.subr.bf16.mxu0 %v3230_v57  ;;  %v549_v56 = vld [vmem:[#allocation3 + $0x2e8] sm:$0xff]  ;;  %v3199_v57 = vcombine.low %v500_v45, %v516_v46  ;;  %v3232_v59 = vcombine.high %v532_v53, %v548_v54  ;;  %v3172_v45 = vcombine.high %v470_v38, %v486_v40 }
 0x1c5   : > { %v3234_v60 = vcombine.high %v533_v55, %v549_v56 }
 0x1c7   : > { %2575 = vmatpush1.bf16.msra.mxu1 %v3227_v62  ;;  %2616 = vmatpush1.bf16.msra.mxu0 %v3229_v63  ;;  %v580_v62 = vld [vmem:[#allocation3 + $0x3e0] sm:$0xff]  ;;  %v565_v63 = vld [vmem:[#allocation3 + $0x368] sm:$0xff] }
 0x1c8   : > { %2576 = vmatprep.subr.bf16.mxu1 %v3260_v1  ;;  %2617 = vmatprep.subr.bf16.mxu0 %v3262_v2  ;;  %v581_v1 = vld [vmem:[#allocation3 + $0x3e8] sm:$0xff]  ;;  %v3231_v2 = vcombine.low %v532_v53, %v548_v54  ;;  %v3264_v3 = vcombine.high %v564_v61, %v580_v62  ;;  %v3204_v53 = vcombine.high %v502_v47, %v518_v48 }
 0x1c9   : > { %v3266_v4 = vcombine.high %v565_v63, %v581_v1 }
 0x1cb   : > { %2577 = vmatpush1.bf16.msra.mxu1 %v3259_v7  ;;  %2618 = vmatpush1.bf16.msra.mxu0 %v3261_v8  ;;  %v597_v7 = vld [vmem:[#allocation3 + $0x468] sm:$0xff] }
 0x1cc   : > { %2578 = vmatprep.subr.bf16.mxu1 %v3292_v9  ;;  %2619 = vmatprep.subr.bf16.mxu0 %v3294_v10  ;;  %v613_v8 = vld [vmem:[#allocation3 + $0x4e8] sm:$0xff]  ;;  %v3263_v9 = vcombine.low %v564_v61, %v580_v62  ;;  %v3265_v10 = vcombine.low %v565_v63, %v581_v1  ;;  %v566_v1 = vld [vmem:[#allocation3 + $0x370] sm:$0xff] }
 0x1cd   : > { %v3298_v12 = vcombine.high %v597_v7, %v613_v8 }
 0x1cf   : > { %2579 = vmatpush1.bf16.msra.mxu1 %v3291_v16  ;;  %2620 = vmatpush1.bf16.msra.mxu0 %v3293_v17  ;;  %v629_v16 = vld [vmem:[#allocation3 + $0x568] sm:$0xff] }
 0x1d0   : > { %2580 = vmatprep.subr.bf16.mxu1 %v3324_v18  ;;  %2621 = vmatprep.subr.bf16.mxu0 %v3326_v19  ;;  %v645_v17 = vld [vmem:[#allocation3 + $0x5e8] sm:$0xff]  ;;  %v3295_v18 = vcombine.low %v596_v5, %v612_v6  ;;  %v3297_v19 = vcombine.low %v597_v7, %v613_v8 }
 0x1d1   : > { %v3330_v21 = vcombine.high %v629_v16, %v645_v17 }
 0x1d3   : > { %2581 = vmatpush1.bf16.msra.mxu1 %v3323_v24  ;;  %2622 = vmatpush1.bf16.msra.mxu0 %v3325_v25  ;;  %v661_v24 = vld [vmem:[#allocation3 + $0x668] sm:$0xff] }
 0x1d4   : > { %2582 = vmatprep.subr.bf16.mxu1 %v3356_v26  ;;  %2623 = vmatprep.subr.bf16.mxu0 %v3358_v27  ;;  %v677_v25 = vld [vmem:[#allocation3 + $0x6e8] sm:$0xff]  ;;  %v3327_v26 = vcombine.low %v628_v13, %v644_v15  ;;  %v3329_v27 = vcombine.low %v629_v16, %v645_v17 }
 0x1d5   : > { %v3362_v29 = vcombine.high %v661_v24, %v677_v25 }
 0x1d7   : > { %2583 = vmatpush1.bf16.msra.mxu1 %v3355_v32  ;;  %2624 = vmatpush1.bf16.msra.mxu0 %v3357_v33  ;;  %v693_v32 = vld [vmem:[#allocation3 + $0x768] sm:$0xff] }
 0x1d8   : > { %2584 = vmatprep.subr.bf16.mxu1 %v3388_v34  ;;  %2625 = vmatprep.subr.bf16.mxu0 %v3390_v35  ;;  %v709_v33 = vld [vmem:[#allocation3 + $0x7e8] sm:$0xff]  ;;  %v3359_v34 = vcombine.low %v660_v22, %v676_v23  ;;  %v3361_v35 = vcombine.low %v661_v24, %v677_v25 }
 0x1d9   : > { %v3394_v37 = vcombine.high %v693_v32, %v709_v33 }
 0x1db   : > { %2585 = vmatpush1.bf16.msra.mxu1 %v3387_v41  ;;  %2626 = vmatpush1.bf16.msra.mxu0 %v3389_v42  ;;  %v471_v41 = vld [vmem:[#allocation3 + $0x78] sm:$0xff] }
 0x1dc   : > { %2652 = vmatprep.subr.bf16.mxu1 %v3168_v43  ;;  %2693 = vmatprep.subr.bf16.mxu0 %v3170_v44  ;;  %v487_v42 = vld [vmem:[#allocation3 + $0xf8] sm:$0xff]  ;;  %v3391_v43 = vcombine.low %v692_v30, %v708_v31  ;;  %v3393_v44 = vcombine.low %v693_v32, %v709_v33  ;;  %v662_v31 = vld [vmem:[#allocation3 + $0x670] sm:$0xff] }
 0x1dd   : > { %v3174_v46 = vcombine.high %v471_v41, %v487_v42  ;;  %v678_v32 = vld [vmem:[#allocation3 + $0x6f0] sm:$0xff]  ;;  %v663_v33 = vld [vmem:[#allocation3 + $0x678] sm:$0xff] }
 0x1de   : > { %2603 = vmatmul.mubr.bf16.vlgmr.msra.gmra.mrb[20].mxu1 %v3856_v39  ;;  %2644 = vmatmul.mubr.bf16.vlgmr.msra.gmra.mrb[24].mxu0 %v3856_v39  ;;  %v3233_v39 = vcombine.low %v533_v55, %v549_v56  ;;  %v534_v55 = vld [vmem:[#allocation3 + $0x270] sm:$0xff] }
 0x1df   : > { %2653 = vmatpush1.bf16.msra.mxu1 %v3167_v49  ;;  %2694 = vmatpush1.bf16.msra.mxu0 %v3169_v50  ;;  %v503_v49 = vld [vmem:[#allocation3 + $0x178] sm:$0xff]  ;;  %v550_v56 = vld [vmem:[#allocation3 + $0x2f0] sm:$0xff] }
 0x1e0   : > { %2654 = vmatprep.subr.bf16.mxu1 %v3200_v51  ;;  %2695 = vmatprep.subr.bf16.mxu0 %v3202_v52  ;;  %v519_v50 = vld [vmem:[#allocation3 + $0x1f8] sm:$0xff]  ;;  %v3171_v51 = vcombine.low %v470_v38, %v486_v40  ;;  %v3173_v52 = vcombine.low %v471_v41, %v487_v42  ;;  %v3236_v62 = vcombine.high %v534_v55, %v550_v56 }
 0x1e1   : > { %2684 = vmatprep.mubr.bf16.mxu1 %v3694_v14  ;;  %2725 = vmatprep.mubr.bf16.mxu0 %v3694_v14  ;;  %v3206_v54 = vcombine.high %v503_v49, %v519_v50  ;;  %v3205_v61 = vcombine.low %v503_v49, %v519_v50  ;;  %v3235_v5 = vcombine.low %v534_v55, %v550_v56  ;;  %v711_v49 = vld [vmem:[#allocation3 + $0x7f8] sm:$0xff] }
 0x1e2   : > { %v3364_v42 = vcombine.high %v662_v31, %v678_v32 }
 0x1e3   : > { %2655 = vmatpush1.bf16.msra.mxu1 %v3199_v57  ;;  %2696 = vmatpush1.bf16.msra.mxu0 %v3201_v58  ;;  %v535_v57 = vld [vmem:[#allocation3 + $0x278] sm:$0xff] }
 0x1e4   : > { %2656 = vmatprep.subr.bf16.mxu1 %v3232_v59  ;;  %2697 = vmatprep.subr.bf16.mxu0 %v3234_v60  ;;  %v551_v58 = vld [vmem:[#allocation3 + $0x2f8] sm:$0xff]  ;;  %v3203_v60 = vcombine.low %v502_v47, %v518_v48  ;;  %v710_v47 = vld [vmem:[#allocation3 + $0x7f0] sm:$0xff] }
 0x1e5   : > { %v3882_v59 = vld [vmem:[#allocation2] sm:$0xf]  ;;  %v3238_v63 = vcombine.high %v535_v57, %v551_v58  ;;  %v3237_v6 = vcombine.low %v535_v57, %v551_v58 }
 0x1e6   : > { %v695_v48 = vld [vmem:[#allocation3 + $0x778] sm:$0xff] }
 0x1e7   : > { %2657 = vmatpush1.bf16.msra.mxu1 %v3231_v2  ;;  %2698 = vmatpush1.bf16.msra.mxu0 %v3233_v39  ;;  %v582_v2 = vld [vmem:[#allocation3 + $0x3f0] sm:$0xff]  ;;  %v567_v39 = vld [vmem:[#allocation3 + $0x378] sm:$0xff] }
 0x1e8   : > { %2658 = vmatprep.subr.bf16.mxu1 %v3264_v3  ;;  %2699 = vmatprep.subr.bf16.mxu0 %v3266_v4  ;;  %v583_v3 = vld [vmem:[#allocation3 + $0x3f8] sm:$0xff]  ;;  %v720_v4 = vlaneseq  ;;  %v3268_v7 = vcombine.high %v566_v1, %v582_v2  ;;  %v3267_v15 = vcombine.low %v566_v1, %v582_v2  ;;  %v3398_v1 = vcombine.high %v695_v48, %v711_v49 }
 0x1e9   : > { %v3270_v8 = vcombine.high %v567_v39, %v583_v3 }
 0x1ea   : > { %v3888_v13 = vshrl.u32 %v720_v4, 7  ;;  %v3535_v4 = vld [vmem:[%s4135_s3 + $0x8] sm:$0xff]  }
 0x1eb   : > { %2659 = vmatpush1.bf16.msra.mxu1 %v3263_v9  ;;  %2700 = vmatpush1.bf16.msra.mxu0 %v3265_v10  ;;  %v598_v9 = vld [vmem:[#allocation3 + $0x470] sm:$0xff] }
 0x1ec   : > { %2660 = vmatprep.subr.bf16.mxu1 %v3296_v11  ;;  %2701 = vmatprep.subr.bf16.mxu0 %v3298_v12  ;;  %v614_v10 = vld [vmem:[#allocation3 + $0x4f0] sm:$0xff]  ;;  %v599_v11 = vld [vmem:[#allocation3 + $0x478] sm:$0xff]  ;;  %v3891_v22 = vsub.s32 0, %v3888_v13  ;;  %v3894_v23 = vsub.s32 2, %v3888_v13 }
 0x1ed   : > { %v615_v12 = vld [vmem:[#allocation3 + $0x4f8] sm:$0xff]  ;;  %v3300_v16 = vcombine.high %v598_v9, %v614_v10  ;;  %v3299_v24 = vcombine.low %v598_v9, %v614_v10  ;;  %v3957_v9 = vsub.s32 5, %v3888_v13  ;;  %v3960_v10 = vsub.s32 7, %v3888_v13 }
 0x1ee   : > { %v3302_v17 = vcombine.high %v599_v11, %v615_v12  ;;  %v3301_v25 = vcombine.low %v599_v11, %v615_v12 }
 0x1ef   : > { %2661 = vmatpush1.bf16.msra.mxu1 %v3295_v18  ;;  %2702 = vmatpush1.bf16.msra.mxu0 %v3297_v19  ;;  %v630_v18 = vld [vmem:[#allocation3 + $0x570] sm:$0xff] }
 0x1f0   : > { %2662 = vmatprep.subr.bf16.mxu1 %v3328_v20  ;;  %2703 = vmatprep.subr.bf16.mxu0 %v3330_v21  ;;  %v646_v19 = vld [vmem:[#allocation3 + $0x5f0] sm:$0xff]  ;;  %v631_v20 = vld [vmem:[#allocation3 + $0x578] sm:$0xff] }
 0x1f1   : > { %v647_v21 = vld [vmem:[#allocation3 + $0x5f8] sm:$0xff] }
 0x1f2   : > { %v3334_v30 = vcombine.high %v631_v20, %v647_v21  ;;  %v3333_v38 = vcombine.low %v631_v20, %v647_v21 }
 0x1f3   : > { %2663 = vmatpush1.bf16.msra.mxu1 %v3327_v26  ;;  %2704 = vmatpush1.bf16.msra.mxu0 %v3329_v27  ;;  %v3902_v26 = vld [vmem:[%s4138_s6] sm:$0xff]  ;;  %v3905_v27 = vsub.s32 1, %v3888_v13 }
 0x1f4   : > { %2664 = vmatprep.subr.bf16.mxu1 %v3360_v28  ;;  %2705 = vmatprep.subr.bf16.mxu0 %v3362_v29  ;;  %v3908_v28 = vsub.s32 3, %v3888_v13  ;;  %v3332_v29 = vcombine.high %v630_v18, %v646_v19 }
 0x1f5   : > { %v727_v40 = vrot.slane %v3902_v26, %v3905_v27 }
 0x1f6   : > { %v735_v41 = vrot.slane %v3902_v26, %v3908_v28 }
 0x1f7   : > { %2665 = vmatpush1.bf16.msra.mxu1 %v3359_v34  ;;  %2706 = vmatpush1.bf16.msra.mxu0 %v3361_v35  ;;  %v679_v34 = vld [vmem:[#allocation3 + $0x6f8] sm:$0xff]  ;;  %v723_v35 = vrot.slane %v3902_v26, %v3891_v22 }
 0x1f8   : > { %2666 = vmatprep.subr.bf16.mxu1 %v3392_v36  ;;  %2707 = vmatprep.subr.bf16.mxu0 %v3394_v37  ;;  %v731_v36 = vrot.slane %v3902_v26, %v3894_v23  ;;  %v3331_v37 = vcombine.low %v630_v18, %v646_v19 }
 0x1fb   : > { %2667 = vmatpush1.bf16.msra.mxu1 %v3391_v43  ;;  %2708 = vmatpush1.bf16.msra.mxu0 %v3393_v44  ;;  %v3366_v43 = vcombine.high %v663_v33, %v679_v34  ;;  %v694_v44 = vld [vmem:[#allocation3 + $0x770] sm:$0xff] }
 0x1fc   : > { %2734 = vmatprep.subr.bf16.mxu1 %v3172_v45  ;;  %2775 = vmatprep.subr.bf16.mxu0 %v3174_v46  ;;  %v3395_v2 = vcombine.low %v694_v44, %v710_v47 }
 0x1fe   : > { %2685 = vmatmul.mubr.bf16.vlgmr.msra.gmra.mrb[24].mxu1 %v3882_v59  ;;  %2726 = vmatmul.mubr.bf16.vlgmr.msra.gmra.mrb[28].mxu0 %v3882_v59 }
 0x1ff   : > { %2735 = vmatpush1.bf16.msra.mxu1 %v3171_v51  ;;  %2776 = vmatpush1.bf16.msra.mxu0 %v3173_v52 }
 0x200   : > { %2736 = vmatprep.subr.bf16.mxu1 %v3204_v53  ;;  %2777 = vmatprep.subr.bf16.mxu0 %v3206_v54  ;;  %v3363_v54 = vcombine.low %v662_v31, %v678_v32 }
 0x201   : > { %2766 = vmatprep.mubr.bf16.mxu1 %v3694_v14  ;;  %2807 = vmatprep.mubr.bf16.mxu0 %v3694_v14  ;;  %v3269_v14 = vcombine.low %v567_v39, %v583_v3  ;;  %v3397_v39 = vcombine.low %v695_v48, %v711_v49  ;;  %v3534_v3 = vld [vmem:[%s4135_s3] sm:$0xff]  }
 0x203   : > { %2737 = vmatpush1.bf16.msra.mxu1 %v3203_v60  ;;  %2778 = vmatpush1.bf16.msra.mxu0 %v3205_v61  ;;  %v3365_v60 = vcombine.low %v663_v33, %v679_v34  ;;  %v3541_v33 = vld [vmem:[%s4135_s3 + $0x38] sm:$0xff]   ;;  %v2851_v34 = vld [vmem:[#allocation2] sm:$0xf] }
 0x204   : > { %2738 = vmatprep.subr.bf16.mxu1 %v3236_v62  ;;  %2779 = vmatprep.subr.bf16.mxu0 %v3238_v63  ;;  %v3396_v63 = vcombine.high %v694_v44, %v710_v47 }
 0x207   : > { %2739 = vmatpush1.bf16.msra.mxu1 %v3235_v5  ;;  %2780 = vmatpush1.bf16.msra.mxu0 %v3237_v6  ;;  %v3536_v5 = vld [vmem:[%s4135_s3 + $0x10] sm:$0xff]   ;;  %v3948_v6 = vsub.s32 4, %v3888_v13 }
 0x208   : > { %2740 = vmatprep.subr.bf16.mxu1 %v3268_v7  ;;  %2781 = vmatprep.subr.bf16.mxu0 %v3270_v8  ;;  %v3951_v7 = vsub.s32 6, %v3888_v13  ;;  %v3538_v8 = vld [vmem:[%s4135_s3 + $0x20] sm:$0xff]   ;;  %v3539_v13 = vld [vmem:[%s4135_s3 + $0x28] sm:$0xff]  }
 0x209   : > { %v739_v11 = vrot.slane %v3902_v26, %v3948_v6 }
 0x20a   : > { %v747_v12 = vrot.slane %v3902_v26, %v3951_v7 }
 0x20b   : > { %2741 = vmatpush1.bf16.msra.mxu1 %v3267_v15  ;;  %2782 = vmatpush1.bf16.msra.mxu0 %v3269_v14  ;;  %v743_v15 = vrot.slane %v3902_v26, %v3957_v9  ;;  %v751_v14 = vrot.slane %v3902_v26, %v3960_v10  ;;  %v3540_v26 = vld [vmem:[%s4135_s3 + $0x30] sm:$0xff]  }
 0x20c   : > { %2742 = vmatprep.subr.bf16.mxu1 %v3300_v16  ;;  %2783 = vmatprep.subr.bf16.mxu0 %v3302_v17 }
 0x20f   : > { %2743 = vmatpush1.bf16.msra.mxu1 %v3299_v24  ;;  %2784 = vmatpush1.bf16.msra.mxu0 %v3301_v25 }
 0x210   : > { %2744 = vmatprep.subr.bf16.mxu1 %v3332_v29  ;;  %2785 = vmatprep.subr.bf16.mxu0 %v3334_v30 }
 0x211   : > { %v2194_v45 = vpop.f32.mrb[0].mxu1  ;;  %v2235_v46 = vpop.f32.mrb[4].mxu0 }
 0x212   : > { %v2195_v50 = vadd.f32 %v2194_v45, %v723_v35  ;;  %v2236_v51 = vadd.f32 %v2235_v46, %v731_v36  ;;  %v2196_v52 = vpop.f32.mrb[1].mxu1  ;;  %v2237_v53 = vpop.f32.mrb[5].mxu0  ;;  %v713_v35 = vld [vmem:[%s4138_s6 + $0x8] sm:$0xff] }
 0x213   : > { %v2197_v55 = vadd.f32 %v2196_v52, %v727_v40  ;;  %v2238_v56 = vadd.f32 %v2237_v53, %v735_v41  ;;  %2745 = vmatpush1.bf16.msra.mxu1 %v3331_v37  ;;  %2786 = vmatpush1.bf16.msra.mxu0 %v3333_v38  ;;  %v2198_v57 = vpop.f32.mrb[2].mxu1  ;;  %v2239_v58 = vpop.f32.mrb[6].mxu0  ;;  %v755_v36 = vrot.slane %v713_v35, %v3891_v22 }
 0x214   : > { %2816 = vst [vmem:[%s3921_s26] sm:$0xff] %v2195_v50  ;;  %2818 = vst [vmem:[%s3921_s26 + $0x10] sm:$0xff] %v2236_v51  ;;  %v2199_v61 = vpop.f32.mrb[3].mxu1  ;;  %v2240_v62 = vpop.f32.mrb[7].mxu0  ;;  %2746 = vmatprep.subr.bf16.mxu1 %v3364_v42  ;;  %2787 = vmatprep.subr.bf16.mxu0 %v3366_v43  ;;  %v763_v37 = vrot.slane %v713_v35, %v3894_v23  ;;  %v759_v38 = vrot.slane %v713_v35, %v3905_v27 }
 0x215   : > { %2817 = vst [vmem:[%s3921_s26 + $0x8] sm:$0xff] %v2197_v55  ;;  %2819 = vst [vmem:[%s3921_s26 + $0x18] sm:$0xff] %v2238_v56  ;;  %v767_v40 = vrot.slane %v713_v35, %v3908_v28  ;;  %v771_v52 = vrot.slane %v713_v35, %v3948_v6  ;;  %v779_v53 = vrot.slane %v713_v35, %v3951_v7 }
 0x216   : > { %v783_v55 = vrot.slane %v713_v35, %v3960_v10 }
 0x217   : > { %2747 = vmatpush1.bf16.msra.mxu1 %v3363_v54  ;;  %2788 = vmatpush1.bf16.msra.mxu0 %v3365_v60  ;;  %v775_v54 = vrot.slane %v713_v35, %v3957_v9 }
 0x218   : > { %2748 = vmatprep.subr.bf16.mxu1 %v3396_v63  ;;  %2789 = vmatprep.subr.bf16.mxu0 %v3398_v1 }
 0x21b   : > { %2749 = vmatpush1.bf16.msra.mxu1 %v3395_v2  ;;  %2790 = vmatpush1.bf16.msra.mxu0 %v3397_v39 }
 0x21c   : > { %3436 = vmatprep.subr.bf16.mxu1 %v3692_v0 }
 0x21e   : > { %2767 = vmatmul.mubr.bf16.vlgmr.msra.gmra.mrb[28].mxu1 %v3882_v59  ;;  %2808 = vmatmul.mubr.bf16.vlgmr.msra.gmra.mrb[32].mxu0 %v3882_v59  ;;  %v3537_v59 = vld [vmem:[%s4135_s3 + $0x18] sm:$0xff]  }
 0x21f   : > { %3437 = vmatpush3.bf16.msra.mxu1 %v3534_v3  ;;  %3452 = vmatprep.mubr.msk.bf16.mxu1 %vm3693_vm0, %v3692_v0 }
 0x220   : > { %3438 = vmatprep.subr.bf16.mxu1 %v3692_v0 }
 0x223   : > { %3439 = vmatpush3.bf16.msra.mxu1 %v3535_v4 }
 0x224   : > { %3440 = vmatprep.subr.bf16.mxu1 %v3692_v0 }
 0x227   : > { %3441 = vmatpush3.bf16.msra.mxu1 %v3536_v5  ;;  %v714_v5 = vld [vmem:[%s4138_s6 + $0x10] sm:$0xff] }
 0x228   : > { %3442 = vmatprep.subr.bf16.mxu1 %v3692_v0 }
 0x22b   : > { %3443 = vmatpush3.bf16.msra.mxu1 %v3537_v59  ;;  %v787_v59 = vrot.slane %v714_v5, %v3891_v22 }
 0x22c   : > { %3444 = vmatprep.subr.bf16.mxu1 %v3692_v0 }
 0x22f   : > { %3445 = vmatpush3.bf16.msra.mxu1 %v3538_v8  ;;  %v795_v8 = vrot.slane %v714_v5, %v3894_v23 }
 0x230   : > { %3446 = vmatprep.subr.bf16.mxu1 %v3692_v0 }
 0x231   : > { %v2276_v16 = vpop.f32.mrb[4].mxu1  ;;  %v2317_v17 = vpop.f32.mrb[8].mxu0 }
 0x232   : > { %v2277_v18 = vadd.f32 %v2276_v16, %v739_v11  ;;  %v2318_v19 = vadd.f32 %v2317_v17, %v747_v12  ;;  %v2278_v20 = vpop.f32.mrb[5].mxu1  ;;  %v2319_v21 = vpop.f32.mrb[9].mxu0  ;;  %v791_v11 = vrot.slane %v714_v5, %v3905_v27  ;;  %v799_v12 = vrot.slane %v714_v5, %v3908_v28 }
 0x233   : > { %v2279_v24 = vadd.f32 %v2278_v20, %v743_v15  ;;  %v2320_v25 = vadd.f32 %v2319_v21, %v751_v14  ;;  %v2280_v29 = vpop.f32.mrb[6].mxu1  ;;  %v2321_v30 = vpop.f32.mrb[10].mxu0  ;;  %3447 = vmatpush3.bf16.msra.mxu1 %v3539_v13 }
 0x234   : > { %2820 = vst [vmem:[%s3921_s26 + $0x20] sm:$0xff] %v2277_v18  ;;  %2822 = vst [vmem:[%s3921_s26 + $0x30] sm:$0xff] %v2318_v19  ;;  %v2281_v31 = vpop.f32.mrb[7].mxu1  ;;  %v2322_v32 = vpop.f32.mrb[11].mxu0  ;;  %3448 = vmatprep.subr.bf16.mxu1 %v3692_v0  ;;  %v803_v30 = vrot.slane %v714_v5, %v3948_v6 }
 0x235   : > { %2821 = vst [vmem:[%s3921_s26 + $0x28] sm:$0xff] %v2279_v24  ;;  %2823 = vst [vmem:[%s3921_s26 + $0x38] sm:$0xff] %v2320_v25  ;;  %v807_v31 = vrot.slane %v714_v5, %v3957_v9  ;;  %v815_v32 = vrot.slane %v714_v5, %v3960_v10 }
 0x237   : > { %3449 = vmatpush3.bf16.msra.mxu1 %v3540_v26  ;;  %v811_v26 = vrot.slane %v714_v5, %v3951_v7 }
 0x238   : > { %3450 = vmatprep.subr.bf16.mxu1 %v3692_v0 }
 0x23b   : > { %3451 = vmatpush3.bf16.msra.mxu1 %v3541_v33 }
 0x23e   : > { %3453 = vmatmul.mubr.bf16.vlgmr.msra.gmra.mrb[32].mxu1 %v2851_v34 }
 0x251   : > { %v2358_v0 = vpop.f32.mrb[8].mxu1  ;;  %v2399_v41 = vpop.f32.mrb[12].mxu0 }
 0x252   : > { %v2359_v42 = vadd.f32 %v2358_v0, %v755_v36  ;;  %v2400_v43 = vadd.f32 %v2399_v41, %v763_v37  ;;  %v2360_v44 = vpop.f32.mrb[9].mxu1  ;;  %v2401_v45 = vpop.f32.mrb[13].mxu0 }
 0x253   : > { %v2361_v46 = vadd.f32 %v2360_v44, %v759_v38  ;;  %v2402_v47 = vadd.f32 %v2401_v45, %v767_v40  ;;  %v2362_v48 = vpop.f32.mrb[10].mxu1  ;;  %v2403_v49 = vpop.f32.mrb[14].mxu0  ;;  %v715_v45 = vld [vmem:[%s4138_s6 + $0x18] sm:$0xff] }
 0x254   : > { %2824 = vst [vmem:[%s3921_s26 + $0x40] sm:$0xff] %v2359_v42  ;;  %2826 = vst [vmem:[%s3921_s26 + $0x50] sm:$0xff] %v2400_v43  ;;  %v2363_v50 = vpop.f32.mrb[11].mxu1  ;;  %v2404_v51 = vpop.f32.mrb[15].mxu0  ;;  %v823_v48 = vrot.slane %v715_v45, %v3905_v27  ;;  %v831_v49 = vrot.slane %v715_v45, %v3908_v28  ;;  %v835_v28 = vrot.slane %v715_v45, %v3948_v6 }
 0x255   : > { %2825 = vst [vmem:[%s3921_s26 + $0x48] sm:$0xff] %v2361_v46  ;;  %2827 = vst [vmem:[%s3921_s26 + $0x58] sm:$0xff] %v2402_v47  ;;  %v819_v46 = vrot.slane %v715_v45, %v3891_v22  ;;  %v827_v47 = vrot.slane %v715_v45, %v3894_v23 }
 0x271   : > { %v2440_v56 = vpop.f32.mrb[12].mxu1  ;;  %v2481_v57 = vpop.f32.mrb[16].mxu0 }
 0x272   : > { %v2441_v58 = vadd.f32 %v2440_v56, %v771_v52  ;;  %v2482_v60 = vadd.f32 %v2481_v57, %v779_v53  ;;  %v2442_v61 = vpop.f32.mrb[13].mxu1  ;;  %v2483_v62 = vpop.f32.mrb[17].mxu0 }
 0x273   : > { %v2443_v63 = vadd.f32 %v2442_v61, %v775_v54  ;;  %v2484_v1 = vadd.f32 %v2483_v62, %v783_v55  ;;  %v2444_v2 = vpop.f32.mrb[14].mxu1  ;;  %v2485_v39 = vpop.f32.mrb[18].mxu0  ;;  %v839_v61 = vrot.slane %v715_v45, %v3957_v9  ;;  %v847_v62 = vrot.slane %v715_v45, %v3960_v10 }
 0x274   : > { %2828 = vst [vmem:[%s3921_s26 + $0x60] sm:$0xff] %v2441_v58  ;;  %2830 = vst [vmem:[%s3921_s26 + $0x70] sm:$0xff] %v2482_v60  ;;  %v2445_v3 = vpop.f32.mrb[15].mxu1  ;;  %v2486_v4 = vpop.f32.mrb[19].mxu0  ;;  %v843_v60 = vrot.slane %v715_v45, %v3951_v7 }
 0x275   : > { %2829 = vst [vmem:[%s3921_s26 + $0x68] sm:$0xff] %v2443_v63  ;;  %2831 = vst [vmem:[%s3921_s26 + $0x78] sm:$0xff] %v2484_v1 }
 0x291   : > { %v2522_v15 = vpop.f32.mrb[16].mxu1  ;;  %v2563_v14 = vpop.f32.mrb[20].mxu0 }
 0x292   : > { %v2523_v13 = vadd.f32 %v2522_v15, %v787_v59  ;;  %v2564_v16 = vadd.f32 %v2563_v14, %v795_v8  ;;  %v2524_v17 = vpop.f32.mrb[17].mxu1  ;;  %v2565_v18 = vpop.f32.mrb[21].mxu0 }
 0x293   : > { %v2525_v19 = vadd.f32 %v2524_v17, %v791_v11  ;;  %v2566_v20 = vadd.f32 %v2565_v18, %v799_v12  ;;  %v2526_v21 = vpop.f32.mrb[18].mxu1  ;;  %v2567_v24 = vpop.f32.mrb[22].mxu0 }
 0x294   : > { %2832 = vst [vmem:[%s3921_s26 + $0x80] sm:$0xff] %v2523_v13  ;;  %2834 = vst [vmem:[%s3921_s26 + $0x90] sm:$0xff] %v2564_v16  ;;  %v2527_v25 = vpop.f32.mrb[19].mxu1  ;;  %v2568_v29 = vpop.f32.mrb[23].mxu0 }
 0x295   : > { %2833 = vst [vmem:[%s3921_s26 + $0x88] sm:$0xff] %v2525_v19  ;;  %2835 = vst [vmem:[%s3921_s26 + $0x98] sm:$0xff] %v2566_v20 }
 0x2b1   : > { %v2604_v33 = vpop.f32.mrb[20].mxu1  ;;  %v2645_v34 = vpop.f32.mrb[24].mxu0 }
 0x2b2   : > { %v2605_v35 = vadd.f32 %v2604_v33, %v803_v30  ;;  %v2646_v36 = vadd.f32 %v2645_v34, %v811_v26  ;;  %v2606_v37 = vpop.f32.mrb[21].mxu1  ;;  %v2647_v38 = vpop.f32.mrb[25].mxu0 }
 0x2b3   : > { %v2607_v40 = vadd.f32 %v2606_v37, %v807_v31  ;;  %v2648_v0 = vadd.f32 %v2647_v38, %v815_v32  ;;  %v2608_v41 = vpop.f32.mrb[22].mxu1  ;;  %v2649_v42 = vpop.f32.mrb[26].mxu0 }
 0x2b4   : > { %2836 = vst [vmem:[%s3921_s26 + $0xa0] sm:$0xff] %v2605_v35  ;;  %2838 = vst [vmem:[%s3921_s26 + $0xb0] sm:$0xff] %v2646_v36  ;;  %v2609_v43 = vpop.f32.mrb[23].mxu1  ;;  %v2650_v44 = vpop.f32.mrb[27].mxu0 }
 0x2b5   : > { %2837 = vst [vmem:[%s3921_s26 + $0xa8] sm:$0xff] %v2607_v40  ;;  %2839 = vst [vmem:[%s3921_s26 + $0xb8] sm:$0xff] %v2648_v0 }
 0x2d1   : > { %v2686_v50 = vpop.f32.mrb[24].mxu1  ;;  %v2727_v51 = vpop.f32.mrb[28].mxu0 }
 0x2d2   : > { %v2687_v52 = vadd.f32 %v2686_v50, %v819_v46  ;;  %v2728_v53 = vadd.f32 %v2727_v51, %v827_v47  ;;  %v2688_v54 = vpop.f32.mrb[25].mxu1  ;;  %v2729_v55 = vpop.f32.mrb[29].mxu0 }
 0x2d3   : > { %v2689_v56 = vadd.f32 %v2688_v54, %v823_v48  ;;  %v2730_v57 = vadd.f32 %v2729_v55, %v831_v49  ;;  %v2690_v58 = vpop.f32.mrb[26].mxu1  ;;  %v2731_v22 = vpop.f32.mrb[30].mxu0 }
 0x2d4   : > { %2840 = vst [vmem:[%s3921_s26 + $0xc0] sm:$0xff] %v2687_v52  ;;  %2842 = vst [vmem:[%s3921_s26 + $0xd0] sm:$0xff] %v2728_v53  ;;  %v2691_v23 = vpop.f32.mrb[27].mxu1  ;;  %v2732_v27 = vpop.f32.mrb[31].mxu0 }
 0x2d5   : > { %2841 = vst [vmem:[%s3921_s26 + $0xc8] sm:$0xff] %v2689_v56  ;;  %2843 = vst [vmem:[%s3921_s26 + $0xd8] sm:$0xff] %v2730_v57 }
 0x2f1   : > { %v2768_v63 = vpop.f32.mrb[28].mxu1  ;;  %v2809_v1 = vpop.f32.mrb[32].mxu0 }
 0x2f2   : > { %v2769_v2 = vadd.f32 %v2768_v63, %v835_v28  ;;  %v2810_v39 = vadd.f32 %v2809_v1, %v843_v60  ;;  %v2770_v3 = vpop.f32.mrb[29].mxu1  ;;  %v2811_v4 = vpop.f32.mrb[33].mxu0 }
 0x2f3   : > { %v2771_v6 = vadd.f32 %v2770_v3, %v839_v61  ;;  %v2812_v7 = vadd.f32 %v2811_v4, %v847_v62  ;;  %v2772_v5 = vpop.f32.mrb[30].mxu1  ;;  %v2813_v9 = vpop.f32.mrb[34].mxu0 }
 0x2f4   : > { %2844 = vst [vmem:[%s3921_s26 + $0xe0] sm:$0xff] %v2769_v2  ;;  %2846 = vst [vmem:[%s3921_s26 + $0xf0] sm:$0xff] %v2810_v39  ;;  %v2773_v10 = vpop.f32.mrb[31].mxu1  ;;  %v2814_v59 = vpop.f32.mrb[35].mxu0 }
 0x2f5   : > { %2845 = vst [vmem:[%s3921_s26 + $0xe8] sm:$0xff] %v2771_v6  ;;  %2847 = vst [vmem:[%s3921_s26 + $0xf8] sm:$0xff] %v2812_v7 }
 0x2f6   : > { %3586 = shalt.err (!%p3583_p6)
}
 0x2f7   : > { %s3587_s26 = scalar_lea.hbm %s4045_s11, 4096  ;;  %s3591_s25 = scalar_lea.hbm %s4139_s7, 8192 }
 0x2f8   : > { %p3588_p7 = scmp.ne.s32.totalorder %s4045_s11, %s3587_s26  ;;  %p3592_p0 = scmp.lt.u32.totalorder %s4045_s11, %s4139_s7 }
 0x2f9   : > { %p3593_p2 = scmp.lt.u32.totalorder %s3591_s25, %s3587_s26  ;;  %p3595_p8 = scmp.lt.u32.totalorder %s3587_s26, %s4045_s11 }
 0x2fa   : > { %p3589_p9 = pnand %p3588_p7, %p4154_p10 }
 0x2fb   : > { %p3594_p4 = por %p3593_p2, %p3592_p0 }
 0x2fc   : > { %p3590_p12 = pneg %p3589_p9 }
 0x2fd   : > { %p3596_p11 = por %p3595_p8, %p3594_p4 }
 0x2ff   : > { %p3597_p13 = pnand %p3596_p11, %p3590_p12 }
 0x301   : > { %3600 = shalt.err (!%p3597_p13)
}
 0x302   : > { %3460 = dma.vmem_to_hbm [thread:$0]  (%p4154_p10), %s4047_s20, 4096, %s4045_s11, %s2966_s22   ;;  %v3399_v8 = vld [vmem:[%s4136_s4] ss:$0 sm:$0xff] }
 0x303   : > { %s3137_s23 = sshll.u32 %s3897_s12, 3  ;;  %s3412_s24 = sshll.u32 %s3679_s30, 7 }
 0x304   : > { %s358_s25 = scalar_lea.vmem [#allocation7], %s3137_s23  ;;  %s4083_s0 = scalar_lea.hbm %s4140_s8, %s3412_s24 }
 0x305   : > { %s3000_s26 = sshll.u32 %s358_s25, 4  ;;  %s2971_s30 = scalar_lea.sflag [#allocation8], %s3897_s12  ;;  %s4085_s26 = int_to_ptr.vmem [resolvable:$true] %s3000_s26 }
 0x306   : > { %s3601_s20 = scalar_lea.vmem %s4085_s26, 128  ;;  %s3696_s11 = smov [#allocation7]  }
 0x307   : > { %p3602_p1 = scmp.ne.s32.totalorder %s4085_s26, %s3601_s20  ;;  %s3605_s22 = sshll.u32 %s3696_s11, 4  ;;  %s3606_s22 = int_to_ptr.vmem [resolvable:$false] %s3605_s22 }
 0x308   : > { %s3607_s23 = scalar_lea.vmem %s3606_s22, 256  ;;  %p3608_p6 = scmp.lt.s32.totalorder %s4085_s26, %s3606_s22 }
 0x309   : > { %p3603_p3 = pnand %p3602_p1, %p4154_p10  ;;  %p3609_p7 = scmp.lt.s32.totalorder %s3607_s23, %s3601_s20 }
 0x30b   : > { %p3604_p5 = pneg %p3603_p3  ;;  %p3610_p9 = por %p3609_p7, %p3608_p6 }
 0x30d   : > { %p3611_p12 = pnand %p3610_p9, %p3604_p5 }
 0x311   : > { %v2957_v11 = vpop.f32.mrb[32].mxu1 }
 0x312   : > { %v2958_v12 = vadd.f32 %v3399_v8, %v2957_v11  ;;  %v3454_v15 = vpop.f32.mrb[33].mxu1 }
 0x313   : > { %v2960_v14 = vpop.f32.mrb[34].mxu1 }
 0x314   : > { %v3455_v13 = vpop.f32.mrb[35].mxu1  ;;  %2964 = vst.msk [vmem:[%s358_s25] sm:$0xff] %vm400_vm1, %v2958_v12 }
 0x315   : > { %3614 = shalt.err (!%p3611_p12)
}
 0x316   : > { %s3615_s12 = scalar_lea.hbm %s4083_s0, 128  ;;  %s3619_s24 = scalar_lea.hbm %s4140_s8, 256 }
 0x317   : > { %p3616_p0 = scmp.ne.s32.totalorder %s4083_s0, %s3615_s12  ;;  %p3620_p8 = scmp.lt.u32.totalorder %s4083_s0, %s4140_s8 }
 0x318   : > { %p3621_p11 = scmp.lt.u32.totalorder %s3619_s24, %s3615_s12  ;;  %p3623_p1 = scmp.lt.u32.totalorder %s3615_s12, %s4083_s0 }
 0x319   : > { %p3617_p2 = pnand %p3616_p0, %p4154_p10 }
 0x31a   : > { %p3622_p13 = por %p3621_p11, %p3620_p8 }
 0x31b   : > { %p3618_p4 = pneg %p3617_p2 }
 0x31c   : > { %p3624_p3 = por %p3623_p1, %p3622_p13 }
 0x31e   : > { %p3625_p5 = pnand %p3624_p3, %p3618_p4 }
 0x320   : > { %3628 = shalt.err (!%p3625_p5)
}
 0x321   : > { %3461 = dma.vmem_to_hbm [thread:$0]  (%p4154_p10), %s4085_s26, 128, %s4083_s0, %s2971_s30  }
 0x322 PF: > { %p3477_p6 = scmp.ge.s32.totalorder %s3687_s10, 2  ;;  %s3012_s14 = sand.u32 1, %s3667_s27  }
 0x323   : > { %p4155_p7 = scmp.ne.s32.totalorder %s4147_s17, 0  ;;  %s3013_s20 = scalar_lea.sflag [#allocation5], %s3012_s14 }
 0x325   : > { %p3469_p9 = pnand %p3477_p6, %p4155_p7 }
 0x327   : > { %3658 = dma.done.wait (!%p3469_p9), %s3013_s20, 4096  }
 0x328   : > { %3660 = vsyncadd (!%p3469_p9), %s3013_s20, 4294963200  ;;  %s3022_s11 = scalar_lea.sflag [#allocation8], %s3012_s14 }
 0x329   : > { %3662 = dma.done.wait (!%p3469_p9), %s3022_s11, 128  }
 0x32a   : > { %3664 = vsyncadd (!%p3469_p9), %s3022_s11, 4294967168  ;;  %s26_s10 = sadd.s32 1, %s3687_s10   ;;  %s4156_s27 = smov %s3671_s28 }
 0x32b   : > { %p23_p12 = scmp.ge.s32.totalorder %s26_s10, 4   ;;  %s4157_s28 = smov %s3675_s29 }
 0x32c   : > { %s4158_s29 = smov %s3795_s18  ;;  %s4159_s30 = smov %s3683_s9 }
 0x32d   : > { %s4160_s9 = smov %s4162_s13  ;;  %25 = sbr.rel (!%p23_p12) target bundleno = 9 (0x9), region = 117 }
 0x334   :  { %3027 = vsyncpa [#allocation4], 1 }
 0x335   :  { %3029 = vsyncpa [#allocation4 + $0x1], 1 }
 0x336   :  { %3030 = vsyncpa [#allocation5], 1 }
 0x337   :  { %3032 = vsyncpa [#allocation5 + $0x1], 1 }
 0x338   :  { %3033 = vsyncpa [#allocation8], 1 }
 0x339   :  { %3035 = vsyncpa [#allocation8 + $0x1], 1 }

</bundles_post_ra>
